<compile_context>
chip_gen: v7x
topology: tpu7x:2x2x1
jax: 0.10.0
libtpu: 0.0.40
codegen_flags: <defaults>
</compile_context>

<pallas_src>
import jax
import jax.numpy as jnp
from jax import lax
from jax.experimental import pallas as pl
from jax.experimental.pallas import tpu as pltpu
import numpy as np


def _round_up(x, m):
    return ((x + m - 1) // m) * m


def _lstm_pool_kernel(x_ref, wif_ref, whf_ref, bf_ref, wib_ref, bb_ref,
                      psf_ref, psb_ref, pdf_ref, pdb_ref,
                      out_ref,
                      xproj_ref, h_ref, c_ref):
    # x_ref:    (tT, tB, D)   bf16, time-major chunk of the input
    # wif/wib:  (D, 4H) bf16  input-proj weights (fwd / bwd); whf: (H, 4H) f32
    # bf/bb:    (1, 4H) f32   fused biases (b_ih + b_hh)
    # ps*/pd*:  (H, H)  f32   pair-pooling projection matrices (per direction)
    # out_ref:  (tB, 2H) f32
    # scratch:  xproj_ref (tT, tB, 4H) f32; h_ref/c_ref (tB, H) f32 carried over chunks
    tT, tB, D = x_ref.shape
    H = whf_ref.shape[0]
    G = 4 * H
    t_idx = pl.program_id(1)

    @pl.when(t_idx == 0)
    def _init():
        h_ref[...] = jnp.zeros_like(h_ref)
        c_ref[...] = jnp.zeros_like(c_ref)

    # --- One big bf16 MXU matmul: input projection (+bias) for the whole time chunk. ---
    x_flat = x_ref[...].reshape(tT * tB, D)                               # bf16, tile-aligned collapse
    xproj = jnp.dot(x_flat, wif_ref[...],
                    preferred_element_type=jnp.float32) + bf_ref[...]     # (tT*tB, 4H) f32, bias broadcast once
    xproj_ref[...] = xproj.reshape(tT, tB, G)

    whf = whf_ref[...]                                                    # hoisted (H, 4H) f32

    # --- Forward recurrence over this chunk: only h@W_hh + gates per step. ---
    def step(t, carry):
        h, c = carry
        g = xproj_ref[t] + jnp.dot(h, whf, preferred_element_type=jnp.float32)   # (tB, 4H)
        # NOTE: with H=32 these gate slices are sub-128-lane; for a tunable model prefer
        # H a multiple of 128 so i/f/g/o land on vreg-aligned lane blocks.
        i_g = jax.nn.sigmoid(g[:, 0 * H:1 * H])
        f_g = jax.nn.sigmoid(g[:, 1 * H:2 * H])
        g_g = jnp.tanh(g[:, 2 * H:3 * H])
        o_g = jax.nn.sigmoid(g[:, 3 * H:4 * H])
        c = f_g * c + i_g * g_g
        h = o_g * jnp.tanh(c)
        return (h, c)

    unroll = True if tT <= 8 else 4
    h, c = lax.fori_loop(0, tT, step, (h_ref[...], c_ref[...]), unroll=unroll)
    h_ref[...] = h
    c_ref[...] = c

    # --- Last chunk: reverse direction (one step from zero state) + pair pooling. ---
    @pl.when(t_idx == pl.num_programs(1) - 1)
    def _finalize():
        h_fwd = h
        # zero initial state => c_b = i*g (forget gate multiplies 0), h@W_hh_b term is 0.
        gb = (jnp.dot(x_ref[tT - 1], wib_ref[...],
                      preferred_element_type=jnp.float32) + bb_ref[...])  # (tB, 4H)
        i_b = jax.nn.sigmoid(gb[:, 0 * H:1 * H])
        g_b = jnp.tanh(gb[:, 2 * H:3 * H])
        o_b = jax.nn.sigmoid(gb[:, 3 * H:4 * H])
        h_bwd = o_b * jnp.tanh(i_b * g_b)

        # Pair max/avg pooling over y[:, -1] = [h_fwd, h_bwd] via constant projections.
        s = (jnp.dot(h_fwd, psf_ref[...], preferred_element_type=jnp.float32)
             + jnp.dot(h_bwd, psb_ref[...], preferred_element_type=jnp.float32))   # y[2k]+y[2k+1]
        d = (jnp.dot(h_fwd, pdf_ref[...], preferred_element_type=jnp.float32)
             + jnp.dot(h_bwd, pdb_ref[...], preferred_element_type=jnp.float32))   # y[2k]-y[2k+1]
        # Single lane-dense store: [max_pool | avg_pool]  (tB, 2H)
        out_ref[...] = jnp.concatenate([0.5 * (s + jnp.abs(d)), 0.5 * s], axis=1)


def lstm_pool(x, params, *, t_chunk=128):
    """x: (B, T, D) batch-first (PyTorch convention). Returns (B, 2H) float32."""
    B, T, D = x.shape
    H = params["w_hh_f"].shape[0]
    G = 4 * H

    # Pad batch to a multiple of 16 (bf16 sublane packing; also a multiple of f32's 8).
    Bp = _round_up(max(B, 16), 16)
    if Bp <= 128:
        tB = Bp
    else:
        tB = 128
        Bp = _round_up(Bp, tB)

    # Time chunk: largest divisor of T not exceeding the requested chunk size.
    tT = max(1, min(t_chunk, T))
    while T % tT:
        tT -= 1

    # Batch-first -> time-major; bf16 for the streamed input + input-proj weights.
    x_p = jnp.pad(x.astype(jnp.float32), ((0, Bp - B), (0, 0), (0, 0)))
    x_tm = jnp.transpose(x_p, (1, 0, 2)).astype(jnp.bfloat16)             # (T, Bp, D)

    wif = params["w_ih_f"].astype(jnp.bfloat16)
    wib = params["w_ih_b"].astype(jnp.bfloat16)
    whf = params["w_hh_f"].astype(jnp.float32)
    bf = params["b_f"].astype(jnp.float32)
    bb = params["b_b"].astype(jnp.float32)
    # NOTE: w_hh_b is intentionally not passed: the reverse step starts from zero state.

    # Pair-pooling projection matrices, pre-split per direction: (H, H) each.
    psum = jnp.repeat(jnp.eye(H, dtype=jnp.float32), 2, axis=0)           # (2H, H): rows 2k,2k+1 -> e_k
    signs = jnp.tile(jnp.array([1.0, -1.0], jnp.float32), H)[:, None]     # +,-,+,-,...
    pdiff = signs * psum
    psf, psb = psum[:H], psum[H:]
    pdf, pdb = pdiff[:H], pdiff[H:]

    nB, nT = Bp // tB, T // tT
    const = lambda b, t: (0, 0)
    grid_spec = pltpu.PrefetchScalarGridSpec(
        num_scalar_prefetch=0,
        grid=(nB, nT),                                       # (batch parallel, time arbitrary)
        in_specs=[
            pl.BlockSpec((tT, tB, D), lambda b, t: (t, b, 0)),   # streamed x chunk
            pl.BlockSpec((D, G), const),                         # W_ih_f  (bf16)
            pl.BlockSpec((H, G), const),                         # W_hh_f  (f32)
            pl.BlockSpec((1, G), const),                         # b_f
            pl.BlockSpec((D, G), const),                         # W_ih_b  (bf16)
            pl.BlockSpec((1, G), const),                         # b_b
            pl.BlockSpec((H, H), const),                         # psum_f
            pl.BlockSpec((H, H), const),                         # psum_b
            pl.BlockSpec((H, H), const),                         # pdiff_f
            pl.BlockSpec((H, H), const),                         # pdiff_b
        ],
        out_specs=pl.BlockSpec((tB, 2 * H), lambda b, t: (b, 0)),
        scratch_shapes=[
            pltpu.VMEM((tT, tB, G), jnp.float32),   # hoisted input projection for the chunk
            pltpu.VMEM((tB, H), jnp.float32),       # h carried across time chunks
            pltpu.VMEM((tB, H), jnp.float32),       # c carried across time chunks
        ],
    )

    flops = (2 * T * Bp * D * G          # forward input projection
             + 2 * T * Bp * H * G        # forward recurrent matmul
             + 2 * Bp * D * G            # reverse direction, single step
             + 8 * Bp * H * H)           # pair-pooling projections
    transcendentals = 5 * T * Bp * H + 4 * Bp * H
    bytes_accessed = (T * Bp * D * 2                       # x (bf16)
                      + 2 * D * G * 2 + H * G * 4          # weights
                      + 2 * G * 4 + 4 * H * H * 4          # biases + pooling mats
                      + Bp * 2 * H * 4)                    # output

    out = pl.pallas_call(
        _lstm_pool_kernel,
        out_shape=jax.ShapeDtypeStruct((Bp, 2 * H), jnp.float32),
        grid_spec=grid_spec,
        compiler_params=pltpu.CompilerParams(
            dimension_semantics=("parallel", "arbitrary"),
            vmem_limit_bytes=32 * 1024 * 1024,   # explicit, safe on v5e/v6e/v7x
        ),
        cost_estimate=pl.CostEstimate(flops=flops,
                                      transcendentals=transcendentals,
                                      bytes_accessed=bytes_accessed),
    )(x_tm, wif, whf, bf, wib, bb, psf, psb, pdf, pdb)
    return out[:B]


def lstm_pool_ref(x, params):
    """Pure-JAX f32 reference: full BiLSTM + MaxPool1d/AvgPool1d(2) + [:, -1]."""
    B, T, D = x.shape
    H = params["w_hh_f"].shape[0]

    def make_step(w_i, w_h, b):
        def step(carry, x_t):
            h, c = carry
            g = x_t @ w_i + h @ w_h + b
            i_g = jax.nn.sigmoid(g[:, :H])
            f_g = jax.nn.sigmoid(g[:, H:2 * H])
            g_g = jnp.tanh(g[:, 2 * H:3 * H])
            o_g = jax.nn.sigmoid(g[:, 3 * H:])
            c = f_g * c + i_g * g_g
            h = o_g * jnp.tanh(c)
            return (h, c), h
        return step

    h0 = jnp.zeros((B, H), jnp.float32)
    c0 = jnp.zeros((B, H), jnp.float32)
    xs = jnp.transpose(x, (1, 0, 2))                       # (T, B, D)
    _, hs_f = lax.scan(make_step(params["w_ih_f"], params["w_hh_f"], params["b_f"]), (h0, c0), xs)
    _, hs_b = lax.scan(make_step(params["w_ih_b"], params["w_hh_b"], params["b_b"]), (h0, c0), xs[::-1])
    hs_b = hs_b[::-1]
    y = jnp.concatenate([hs_f, hs_b], axis=-1)             # (T, B, 2H)
    y_last = y[-1]                                         # (B, 2H)
    pairs = y_last.reshape(B, H, 2)
    return jnp.concatenate([pairs.max(-1), pairs.mean(-1)], axis=1)


def init_params(key, input_size, hidden_size):
    """Deterministic init mimicking nn.LSTM's uniform(-1/sqrt(H), 1/sqrt(H)).
    Weights stored pre-transposed as (in, 4H); b = b_ih + b_hh as (1, 4H).
    Gate ordering matches PyTorch: [i, f, g, o]."""
    k = 1.0 / np.sqrt(hidden_size)
    keys = jax.random.split(key, 10)
    u = lambda kk, shape: jax.random.uniform(kk, shape, jnp.float32, minval=-k, maxval=k)
    return {
        "w_ih_f": u(keys[0], (input_size, 4 * hidden_size)),
        "w_hh_f": u(keys[1], (hidden_size, 4 * hidden_size)),
        "b_f": u(keys[2], (1, 4 * hidden_size)) + u(keys[3], (1, 4 * hidden_size)),
        "w_ih_b": u(keys[4], (input_size, 4 * hidden_size)),
        "w_hh_b": u(keys[5], (hidden_size, 4 * hidden_size)),
        "b_b": u(keys[6], (1, 4 * hidden_size)) + u(keys[7], (1, 4 * hidden_size)),
    }


if __name__ == "__main__":
    B, T, D, H = 2, 8, 16, 32   # batch, seq, input_size, output_size (hidden)

    root = jax.random.PRNGKey(0)
    kx, kp = jax.random.split(root)
    x = jax.random.normal(kx, (B, T, D), jnp.float32)
    params = init_params(kp, D, H)

    # t_chunk=4 -> 2 time chunks: exercises the scratch-carried h/c across grid steps.
    out = jax.block_until_ready(lstm_pool(x, params, t_chunk=4))
    ref = jax.block_until_ready(lstm_pool_ref(x, params))

    assert out.shape == (B, 2 * H), f"bad output shape {out.shape}"
    # bf16 is used for the streamed input projection (perf feedback); tolerance reflects that.
    np.testing.assert_allclose(np.asarray(out), np.asarray(ref), rtol=3e-2, atol=3e-2)

    print("KERNEL_OK")
</pallas_src>

<mosaic_0001>
module attributes {stable_mosaic.version = 11 : i64} {
  func.func @_lstm_pool_kernel(%arg0: i32, %arg1: i32, %arg2: memref<4x16x16xbf16, #tpu.memory_space<vmem>>, %arg3: memref<16x128xbf16, #tpu.memory_space<vmem>>, %arg4: memref<32x128xf32, #tpu.memory_space<vmem>>, %arg5: memref<1x128xf32, #tpu.memory_space<vmem>>, %arg6: memref<16x128xbf16, #tpu.memory_space<vmem>>, %arg7: memref<1x128xf32, #tpu.memory_space<vmem>>, %arg8: memref<32x32xf32, #tpu.memory_space<vmem>>, %arg9: memref<32x32xf32, #tpu.memory_space<vmem>>, %arg10: memref<32x32xf32, #tpu.memory_space<vmem>>, %arg11: memref<32x32xf32, #tpu.memory_space<vmem>>, %arg12: memref<16x64xf32, #tpu.memory_space<vmem>>, %arg13: memref<4x16x128xf32, #tpu.memory_space<vmem>>, %arg14: memref<16x32xf32, #tpu.memory_space<vmem>>, %arg15: memref<16x32xf32, #tpu.memory_space<vmem>>) attributes {dimension_semantics = [#tpu.dimension_semantics<parallel>, #tpu.dimension_semantics<arbitrary>], iteration_bounds = array<i64: 1, 2>, scalar_prefetch = 0 : i64, scratch_operands = 3 : i64, tpu.core_type = #tpu.core_type<tc>, window_params = [{transform_indices = @transform_0, window_bounds = array<i64: 4, 16, 16>}, {pipeline_mode = #tpu.pipeline_mode<synchronous>, transform_indices = @transform_1, window_bounds = array<i64: 16, 128>}, {pipeline_mode = #tpu.pipeline_mode<synchronous>, transform_indices = @transform_2, window_bounds = array<i64: 32, 128>}, {pipeline_mode = #tpu.pipeline_mode<synchronous>, transform_indices = @transform_3, window_bounds = array<i64: 1, 128>}, {pipeline_mode = #tpu.pipeline_mode<synchronous>, transform_indices = @transform_4, window_bounds = array<i64: 16, 128>}, {pipeline_mode = #tpu.pipeline_mode<synchronous>, transform_indices = @transform_5, window_bounds = array<i64: 1, 128>}, {pipeline_mode = #tpu.pipeline_mode<synchronous>, transform_indices = @transform_6, window_bounds = array<i64: 32, 32>}, {pipeline_mode = #tpu.pipeline_mode<synchronous>, transform_indices = @transform_7, window_bounds = array<i64: 32, 32>}, {pipeline_mode = #tpu.pipeline_mode<synchronous>, transform_indices = @transform_8, window_bounds = array<i64: 32, 32>}, {pipeline_mode = #tpu.pipeline_mode<synchronous>, transform_indices = @transform_9, window_bounds = array<i64: 32, 32>}, {transform_indices = @transform_10, window_bounds = array<i64: 16, 64>}]} {
    %c0_i32 = arith.constant 0 : i32
    %0 = arith.cmpi eq, %arg1, %c0_i32 : i32
    %1 = arith.extui %0 : i1 to i32
    %c0_i32_0 = arith.constant 0 : i32
    %2 = arith.cmpi ne, %1, %c0_i32_0 : i32
    scf.if %2 {
      %cst_47 = arith.constant 0.000000e+00 : f32
      %140 = vector.broadcast %cst_47 : f32 to vector<16x32xf32>
      %c0_48 = arith.constant 0 : index
      %c0_49 = arith.constant 0 : index
      %141 = vector.load %arg14[%c0_48, %c0_49] : memref<16x32xf32, #tpu.memory_space<vmem>>, vector<16x32xf32>
      tpu.vector_store %arg14[%c0_48, %c0_49], %140 {strides = array<i32>} : memref<16x32xf32, #tpu.memory_space<vmem>>, vector<16x32xf32>,
      %cst_50 = arith.constant 0.000000e+00 : f32
      %142 = vector.broadcast %cst_50 : f32 to vector<16x32xf32>
      %c0_51 = arith.constant 0 : index
      %c0_52 = arith.constant 0 : index
      %143 = vector.load %arg15[%c0_51, %c0_52] : memref<16x32xf32, #tpu.memory_space<vmem>>, vector<16x32xf32>
      tpu.vector_store %arg15[%c0_51, %c0_52], %142 {strides = array<i32>} : memref<16x32xf32, #tpu.memory_space<vmem>>, vector<16x32xf32>,
    } else {
    }
    %c0 = arith.constant 0 : index
    %c0_1 = arith.constant 0 : index
    %c0_2 = arith.constant 0 : index
    %3 = vector.load %arg2[%c0, %c0_1, %c0_2] : memref<4x16x16xbf16, #tpu.memory_space<vmem>>, vector<4x16x16xbf16>
    %4 = vector.shape_cast %3 : vector<4x16x16xbf16> to vector<64x16xbf16>
    %c0_3 = arith.constant 0 : index
    %c0_4 = arith.constant 0 : index
    %5 = vector.load %arg3[%c0_3, %c0_4] : memref<16x128xbf16, #tpu.memory_space<vmem>>, vector<16x128xbf16>
    %cst = arith.constant dense<0.000000e+00> : vector<64x128xf32>
    %6 = tpu.matmul %4, %5, %cst {dimension_numbers = #tpu.dot_dimension_numbers<[1], [0], [0], [1], [0, 0, 1, 1], [], []>} : vector<64x16xbf16>, vector<16x128xbf16>, vector<64x128xf32> -> vector<64x128xf32>
    %c0_5 = arith.constant 0 : index
    %c0_6 = arith.constant 0 : index
    %7 = vector.load %arg5[%c0_5, %c0_6] : memref<1x128xf32, #tpu.memory_space<vmem>>, vector<1x128xf32>
    %8 = vector.broadcast %7 : vector<1x128xf32> to vector<64x128xf32>
    %9 = arith.addf %6, %8 : vector<64x128xf32>
    %10 = vector.shape_cast %9 : vector<64x128xf32> to vector<4x16x128xf32>
    %c0_7 = arith.constant 0 : index
    %c0_8 = arith.constant 0 : index
    %c0_9 = arith.constant 0 : index
    %11 = vector.load %arg13[%c0_7, %c0_8, %c0_9] : memref<4x16x128xf32, #tpu.memory_space<vmem>>, vector<4x16x128xf32>
    tpu.vector_store %arg13[%c0_7, %c0_8, %c0_9], %10 {strides = array<i32>} : memref<4x16x128xf32, #tpu.memory_space<vmem>>, vector<4x16x128xf32>,
    %c0_10 = arith.constant 0 : index
    %c0_11 = arith.constant 0 : index
    %12 = vector.load %arg4[%c0_10, %c0_11] : memref<32x128xf32, #tpu.memory_space<vmem>>, vector<32x128xf32>
    %c0_12 = arith.constant 0 : index
    %c0_13 = arith.constant 0 : index
    %13 = vector.load %arg14[%c0_12, %c0_13] : memref<16x32xf32, #tpu.memory_space<vmem>>, vector<16x32xf32>
    %c0_14 = arith.constant 0 : index
    %c0_15 = arith.constant 0 : index
    %14 = vector.load %arg15[%c0_14, %c0_15] : memref<16x32xf32, #tpu.memory_space<vmem>>, vector<16x32xf32>
    %c0_i32_16 = arith.constant 0 : i32
    %15 = arith.index_cast %c0_i32_16 : i32 to index
    %c0_17 = arith.constant 0 : index
    %c0_18 = arith.constant 0 : index
    %16 = vector.load %arg13[%15, %c0_17, %c0_18] : memref<4x16x128xf32, #tpu.memory_space<vmem>>, vector<1x16x128xf32>
    %17 = vector.shape_cast %16 : vector<1x16x128xf32> to vector<16x128xf32>
    %cst_19 = arith.constant dense<0.000000e+00> : vector<16x128xf32>
    %18 = tpu.matmul %13, %12, %cst_19 {dimension_numbers = #tpu.dot_dimension_numbers<[1], [0], [0], [1], [0, 0, 1, 1], [], []>} : vector<16x32xf32>, vector<32x128xf32>, vector<16x128xf32> -> vector<16x128xf32>
    %19 = arith.addf %17, %18 : vector<16x128xf32>
    %20 = vector.extract_strided_slice %19 {offsets = [0, 0], sizes = [16, 32], strides = [1, 1]} : vector<16x128xf32> to vector<16x32xf32>
    %21 = arith.negf %20 : vector<16x32xf32>
    %22 = math.exp %21 : vector<16x32xf32>
    %cst_20 = arith.constant 1.000000e+00 : f32
    %23 = vector.broadcast %cst_20 : f32 to vector<16x32xf32>
    %24 = arith.addf %23, %22 : vector<16x32xf32>
    %25 = arith.divf %23, %24 : vector<16x32xf32>
    %26 = vector.extract_strided_slice %19 {offsets = [0, 32], sizes = [16, 32], strides = [1, 1]} : vector<16x128xf32> to vector<16x32xf32>
    %27 = arith.negf %26 : vector<16x32xf32>
    %28 = math.exp %27 : vector<16x32xf32>
    %cst_21 = arith.constant 1.000000e+00 : f32
    %29 = vector.broadcast %cst_21 : f32 to vector<16x32xf32>
    %30 = arith.addf %29, %28 : vector<16x32xf32>
    %31 = arith.divf %29, %30 : vector<16x32xf32>
    %32 = vector.extract_strided_slice %19 {offsets = [0, 64], sizes = [16, 32], strides = [1, 1]} : vector<16x128xf32> to vector<16x32xf32>
    %33 = math.tanh %32 : vector<16x32xf32>
    %34 = vector.extract_strided_slice %19 {offsets = [0, 96], sizes = [16, 32], strides = [1, 1]} : vector<16x128xf32> to vector<16x32xf32>
    %35 = arith.negf %34 : vector<16x32xf32>
    %36 = math.exp %35 : vector<16x32xf32>
    %cst_22 = arith.constant 1.000000e+00 : f32
    %37 = vector.broadcast %cst_22 : f32 to vector<16x32xf32>
    %38 = arith.addf %37, %36 : vector<16x32xf32>
    %39 = arith.divf %37, %38 : vector<16x32xf32>
    %40 = arith.mulf %31, %14 : vector<16x32xf32>
    %41 = arith.mulf %25, %33 : vector<16x32xf32>
    %42 = arith.addf %40, %41 : vector<16x32xf32>
    %43 = math.tanh %42 : vector<16x32xf32>
    %44 = arith.mulf %39, %43 : vector<16x32xf32>
    %c1_i32 = arith.constant 1 : i32
    %45 = arith.index_cast %c1_i32 : i32 to index
    %c0_23 = arith.constant 0 : index
    %c0_24 = arith.constant 0 : index
    %46 = vector.load %arg13[%45, %c0_23, %c0_24] : memref<4x16x128xf32, #tpu.memory_space<vmem>>, vector<1x16x128xf32>
    %47 = vector.shape_cast %46 : vector<1x16x128xf32> to vector<16x128xf32>
    %cst_25 = arith.constant dense<0.000000e+00> : vector<16x128xf32>
    %48 = tpu.matmul %44, %12, %cst_25 {dimension_numbers = #tpu.dot_dimension_numbers<[1], [0], [0], [1], [0, 0, 1, 1], [], []>} : vector<16x32xf32>, vector<32x128xf32>, vector<16x128xf32> -> vector<16x128xf32>
    %49 = arith.addf %47, %48 : vector<16x128xf32>
    %50 = vector.extract_strided_slice %49 {offsets = [0, 0], sizes = [16, 32], strides = [1, 1]} : vector<16x128xf32> to vector<16x32xf32>
    %51 = arith.negf %50 : vector<16x32xf32>
    %52 = math.exp %51 : vector<16x32xf32>
    %cst_26 = arith.constant 1.000000e+00 : f32
    %53 = vector.broadcast %cst_26 : f32 to vector<16x32xf32>
    %54 = arith.addf %53, %52 : vector<16x32xf32>
    %55 = arith.divf %53, %54 : vector<16x32xf32>
    %56 = vector.extract_strided_slice %49 {offsets = [0, 32], sizes = [16, 32], strides = [1, 1]} : vector<16x128xf32> to vector<16x32xf32>
    %57 = arith.negf %56 : vector<16x32xf32>
    %58 = math.exp %57 : vector<16x32xf32>
    %cst_27 = arith.constant 1.000000e+00 : f32
    %59 = vector.broadcast %cst_27 : f32 to vector<16x32xf32>
    %60 = arith.addf %59, %58 : vector<16x32xf32>
    %61 = arith.divf %59, %60 : vector<16x32xf32>
    %62 = vector.extract_strided_slice %49 {offsets = [0, 64], sizes = [16, 32], strides = [1, 1]} : vector<16x128xf32> to vector<16x32xf32>
    %63 = math.tanh %62 : vector<16x32xf32>
    %64 = vector.extract_strided_slice %49 {offsets = [0, 96], sizes = [16, 32], strides = [1, 1]} : vector<16x128xf32> to vector<16x32xf32>
    %65 = arith.negf %64 : vector<16x32xf32>
    %66 = math.exp %65 : vector<16x32xf32>
    %cst_28 = arith.constant 1.000000e+00 : f32
    %67 = vector.broadcast %cst_28 : f32 to vector<16x32xf32>
    %68 = arith.addf %67, %66 : vector<16x32xf32>
    %69 = arith.divf %67, %68 : vector<16x32xf32>
    %70 = arith.mulf %61, %42 : vector<16x32xf32>
    %71 = arith.mulf %55, %63 : vector<16x32xf32>
    %72 = arith.addf %70, %71 : vector<16x32xf32>
    %73 = math.tanh %72 : vector<16x32xf32>
    %74 = arith.mulf %69, %73 : vector<16x32xf32>
    %c2_i32 = arith.constant 2 : i32
    %75 = arith.index_cast %c2_i32 : i32 to index
    %c0_29 = arith.constant 0 : index
    %c0_30 = arith.constant 0 : index
    %76 = vector.load %arg13[%75, %c0_29, %c0_30] : memref<4x16x128xf32, #tpu.memory_space<vmem>>, vector<1x16x128xf32>
    %77 = vector.shape_cast %76 : vector<1x16x128xf32> to vector<16x128xf32>
    %cst_31 = arith.constant dense<0.000000e+00> : vector<16x128xf32>
    %78 = tpu.matmul %74, %12, %cst_31 {dimension_numbers = #tpu.dot_dimension_numbers<[1], [0], [0], [1], [0, 0, 1, 1], [], []>} : vector<16x32xf32>, vector<32x128xf32>, vector<16x128xf32> -> vector<16x128xf32>
    %79 = arith.addf %77, %78 : vector<16x128xf32>
    %80 = vector.extract_strided_slice %79 {offsets = [0, 0], sizes = [16, 32], strides = [1, 1]} : vector<16x128xf32> to vector<16x32xf32>
    %81 = arith.negf %80 : vector<16x32xf32>
    %82 = math.exp %81 : vector<16x32xf32>
    %cst_32 = arith.constant 1.000000e+00 : f32
    %83 = vector.broadcast %cst_32 : f32 to vector<16x32xf32>
    %84 = arith.addf %83, %82 : vector<16x32xf32>
    %85 = arith.divf %83, %84 : vector<16x32xf32>
    %86 = vector.extract_strided_slice %79 {offsets = [0, 32], sizes = [16, 32], strides = [1, 1]} : vector<16x128xf32> to vector<16x32xf32>
    %87 = arith.negf %86 : vector<16x32xf32>
    %88 = math.exp %87 : vector<16x32xf32>
    %cst_33 = arith.constant 1.000000e+00 : f32
    %89 = vector.broadcast %cst_33 : f32 to vector<16x32xf32>
    %90 = arith.addf %89, %88 : vector<16x32xf32>
    %91 = arith.divf %89, %90 : vector<16x32xf32>
    %92 = vector.extract_strided_slice %79 {offsets = [0, 64], sizes = [16, 32], strides = [1, 1]} : vector<16x128xf32> to vector<16x32xf32>
    %93 = math.tanh %92 : vector<16x32xf32>
    %94 = vector.extract_strided_slice %79 {offsets = [0, 96], sizes = [16, 32], strides = [1, 1]} : vector<16x128xf32> to vector<16x32xf32>
    %95 = arith.negf %94 : vector<16x32xf32>
    %96 = math.exp %95 : vector<16x32xf32>
    %cst_34 = arith.constant 1.000000e+00 : f32
    %97 = vector.broadcast %cst_34 : f32 to vector<16x32xf32>
    %98 = arith.addf %97, %96 : vector<16x32xf32>
    %99 = arith.divf %97, %98 : vector<16x32xf32>
    %100 = arith.mulf %91, %72 : vector<16x32xf32>
    %101 = arith.mulf %85, %93 : vector<16x32xf32>
    %102 = arith.addf %100, %101 : vector<16x32xf32>
    %103 = math.tanh %102 : vector<16x32xf32>
    %104 = arith.mulf %99, %103 : vector<16x32xf32>
    %c3_i32 = arith.constant 3 : i32
    %105 = arith.index_cast %c3_i32 : i32 to index
    %c0_35 = arith.constant 0 : index
    %c0_36 = arith.constant 0 : index
    %106 = vector.load %arg13[%105, %c0_35, %c0_36] : memref<4x16x128xf32, #tpu.memory_space<vmem>>, vector<1x16x128xf32>
    %107 = vector.shape_cast %106 : vector<1x16x128xf32> to vector<16x128xf32>
    %cst_37 = arith.constant dense<0.000000e+00> : vector<16x128xf32>
    %108 = tpu.matmul %104, %12, %cst_37 {dimension_numbers = #tpu.dot_dimension_numbers<[1], [0], [0], [1], [0, 0, 1, 1], [], []>} : vector<16x32xf32>, vector<32x128xf32>, vector<16x128xf32> -> vector<16x128xf32>
    %109 = arith.addf %107, %108 : vector<16x128xf32>
    %110 = vector.extract_strided_slice %109 {offsets = [0, 0], sizes = [16, 32], strides = [1, 1]} : vector<16x128xf32> to vector<16x32xf32>
    %111 = arith.negf %110 : vector<16x32xf32>
    %112 = math.exp %111 : vector<16x32xf32>
    %cst_38 = arith.constant 1.000000e+00 : f32
    %113 = vector.broadcast %cst_38 : f32 to vector<16x32xf32>
    %114 = arith.addf %113, %112 : vector<16x32xf32>
    %115 = arith.divf %113, %114 : vector<16x32xf32>
    %116 = vector.extract_strided_slice %109 {offsets = [0, 32], sizes = [16, 32], strides = [1, 1]} : vector<16x128xf32> to vector<16x32xf32>
    %117 = arith.negf %116 : vector<16x32xf32>
    %118 = math.exp %117 : vector<16x32xf32>
    %cst_39 = arith.constant 1.000000e+00 : f32
    %119 = vector.broadcast %cst_39 : f32 to vector<16x32xf32>
    %120 = arith.addf %119, %118 : vector<16x32xf32>
    %121 = arith.divf %119, %120 : vector<16x32xf32>
    %122 = vector.extract_strided_slice %109 {offsets = [0, 64], sizes = [16, 32], strides = [1, 1]} : vector<16x128xf32> to vector<16x32xf32>
    %123 = math.tanh %122 : vector<16x32xf32>
    %124 = vector.extract_strided_slice %109 {offsets = [0, 96], sizes = [16, 32], strides = [1, 1]} : vector<16x128xf32> to vector<16x32xf32>
    %125 = arith.negf %124 : vector<16x32xf32>
    %126 = math.exp %125 : vector<16x32xf32>
    %cst_40 = arith.constant 1.000000e+00 : f32
    %127 = vector.broadcast %cst_40 : f32 to vector<16x32xf32>
    %128 = arith.addf %127, %126 : vector<16x32xf32>
    %129 = arith.divf %127, %128 : vector<16x32xf32>
    %130 = arith.mulf %121, %102 : vector<16x32xf32>
    %131 = arith.mulf %115, %123 : vector<16x32xf32>
    %132 = arith.addf %130, %131 : vector<16x32xf32>
    %133 = math.tanh %132 : vector<16x32xf32>
    %134 = arith.mulf %129, %133 : vector<16x32xf32>
    %c4_i32 = arith.constant 4 : i32
    %c0_41 = arith.constant 0 : index
    %c0_42 = arith.constant 0 : index
    %135 = vector.load %arg14[%c0_41, %c0_42] : memref<16x32xf32, #tpu.memory_space<vmem>>, vector<16x32xf32>
    tpu.vector_store %arg14[%c0_41, %c0_42], %134 {strides = array<i32>} : memref<16x32xf32, #tpu.memory_space<vmem>>, vector<16x32xf32>,
    %c0_43 = arith.constant 0 : index
    %c0_44 = arith.constant 0 : index
    %136 = vector.load %arg15[%c0_43, %c0_44] : memref<16x32xf32, #tpu.memory_space<vmem>>, vector<16x32xf32>
    tpu.vector_store %arg15[%c0_43, %c0_44], %132 {strides = array<i32>} : memref<16x32xf32, #tpu.memory_space<vmem>>, vector<16x32xf32>,
    %c1_i32_45 = arith.constant 1 : i32
    %137 = arith.cmpi eq, %arg1, %c1_i32_45 : i32
    %138 = arith.extui %137 : i1 to i32
    %c0_i32_46 = arith.constant 0 : i32
    %139 = arith.cmpi ne, %138, %c0_i32_46 : i32
    scf.if %139 {
      %c3 = arith.constant 3 : index
      %c0_47 = arith.constant 0 : index
      %c0_48 = arith.constant 0 : index
      %140 = vector.load %arg2[%c3, %c0_47, %c0_48] : memref<4x16x16xbf16, #tpu.memory_space<vmem>>, vector<1x16x16xbf16>
      %141 = vector.shape_cast %140 : vector<1x16x16xbf16> to vector<16x16xbf16>
      %c0_49 = arith.constant 0 : index
      %c0_50 = arith.constant 0 : index
      %142 = vector.load %arg6[%c0_49, %c0_50] : memref<16x128xbf16, #tpu.memory_space<vmem>>, vector<16x128xbf16>
      %cst_51 = arith.constant dense<0.000000e+00> : vector<16x128xf32>
      %143 = tpu.matmul %141, %142, %cst_51 {dimension_numbers = #tpu.dot_dimension_numbers<[1], [0], [0], [1], [0, 0, 1, 1], [], []>} : vector<16x16xbf16>, vector<16x128xbf16>, vector<16x128xf32> -> vector<16x128xf32>
      %c0_52 = arith.constant 0 : index
      %c0_53 = arith.constant 0 : index
      %144 = vector.load %arg7[%c0_52, %c0_53] : memref<1x128xf32, #tpu.memory_space<vmem>>, vector<1x128xf32>
      %145 = vector.broadcast %144 : vector<1x128xf32> to vector<16x128xf32>
      %146 = arith.addf %143, %145 : vector<16x128xf32>
      %147 = vector.extract_strided_slice %146 {offsets = [0, 0], sizes = [16, 32], strides = [1, 1]} : vector<16x128xf32> to vector<16x32xf32>
      %148 = arith.negf %147 : vector<16x32xf32>
      %149 = math.exp %148 : vector<16x32xf32>
      %cst_54 = arith.constant 1.000000e+00 : f32
      %150 = vector.broadcast %cst_54 : f32 to vector<16x32xf32>
      %151 = arith.addf %150, %149 : vector<16x32xf32>
      %152 = arith.divf %150, %151 : vector<16x32xf32>
      %153 = vector.extract_strided_slice %146 {offsets = [0, 64], sizes = [16, 32], strides = [1, 1]} : vector<16x128xf32> to vector<16x32xf32>
      %154 = math.tanh %153 : vector<16x32xf32>
      %155 = vector.extract_strided_slice %146 {offsets = [0, 96], sizes = [16, 32], strides = [1, 1]} : vector<16x128xf32> to vector<16x32xf32>
      %156 = arith.negf %155 : vector<16x32xf32>
      %157 = math.exp %156 : vector<16x32xf32>
      %cst_55 = arith.constant 1.000000e+00 : f32
      %158 = vector.broadcast %cst_55 : f32 to vector<16x32xf32>
      %159 = arith.addf %158, %157 : vector<16x32xf32>
      %160 = arith.divf %158, %159 : vector<16x32xf32>
      %161 = arith.mulf %152, %154 : vector<16x32xf32>
      %162 = math.tanh %161 : vector<16x32xf32>
      %163 = arith.mulf %160, %162 : vector<16x32xf32>
      %c0_56 = arith.constant 0 : index
      %c0_57 = arith.constant 0 : index
      %164 = vector.load %arg8[%c0_56, %c0_57] : memref<32x32xf32, #tpu.memory_space<vmem>>, vector<32x32xf32>
      %cst_58 = arith.constant dense<0.000000e+00> : vector<16x32xf32>
      %165 = tpu.matmul %134, %164, %cst_58 {dimension_numbers = #tpu.dot_dimension_numbers<[1], [0], [0], [1], [0, 0, 1, 1], [], []>} : vector<16x32xf32>, vector<32x32xf32>, vector<16x32xf32> -> vector<16x32xf32>
      %c0_59 = arith.constant 0 : index
      %c0_60 = arith.constant 0 : index
      %166 = vector.load %arg9[%c0_59, %c0_60] : memref<32x32xf32, #tpu.memory_space<vmem>>, vector<32x32xf32>
      %cst_61 = arith.constant dense<0.000000e+00> : vector<16x32xf32>
      %167 = tpu.matmul %163, %166, %cst_61 {dimension_numbers = #tpu.dot_dimension_numbers<[1], [0], [0], [1], [0, 0, 1, 1], [], []>} : vector<16x32xf32>, vector<32x32xf32>, vector<16x32xf32> -> vector<16x32xf32>
      %168 = arith.addf %165, %167 : vector<16x32xf32>
      %c0_62 = arith.constant 0 : index
      %c0_63 = arith.constant 0 : index
      %169 = vector.load %arg10[%c0_62, %c0_63] : memref<32x32xf32, #tpu.memory_space<vmem>>, vector<32x32xf32>
      %cst_64 = arith.constant dense<0.000000e+00> : vector<16x32xf32>
      %170 = tpu.matmul %134, %169, %cst_64 {dimension_numbers = #tpu.dot_dimension_numbers<[1], [0], [0], [1], [0, 0, 1, 1], [], []>} : vector<16x32xf32>, vector<32x32xf32>, vector<16x32xf32> -> vector<16x32xf32>
      %c0_65 = arith.constant 0 : index
      %c0_66 = arith.constant 0 : index
      %171 = vector.load %arg11[%c0_65, %c0_66] : memref<32x32xf32, #tpu.memory_space<vmem>>, vector<32x32xf32>
      %cst_67 = arith.constant dense<0.000000e+00> : vector<16x32xf32>
      %172 = tpu.matmul %163, %171, %cst_67 {dimension_numbers = #tpu.dot_dimension_numbers<[1], [0], [0], [1], [0, 0, 1, 1], [], []>} : vector<16x32xf32>, vector<32x32xf32>, vector<16x32xf32> -> vector<16x32xf32>
      %173 = arith.addf %170, %172 : vector<16x32xf32>
      %174 = math.absf %173 : vector<16x32xf32>
      %175 = arith.addf %168, %174 : vector<16x32xf32>
      %cst_68 = arith.constant 5.000000e-01 : f32
      %176 = vector.broadcast %cst_68 : f32 to vector<16x32xf32>
      %177 = arith.mulf %176, %175 : vector<16x32xf32>
      %cst_69 = arith.constant 5.000000e-01 : f32
      %178 = vector.broadcast %cst_69 : f32 to vector<16x32xf32>
      %179 = arith.mulf %178, %168 : vector<16x32xf32>
      %180 = tpu.concatenate %177, %179 in 1 : vector<16x32xf32>, vector<16x32xf32> -> vector<16x64xf32>
      %c0_70 = arith.constant 0 : index
      %c0_71 = arith.constant 0 : index
      %181 = vector.load %arg12[%c0_70, %c0_71] : memref<16x64xf32, #tpu.memory_space<vmem>>, vector<16x64xf32>
      tpu.vector_store %arg12[%c0_70, %c0_71], %180 {strides = array<i32>} : memref<16x64xf32, #tpu.memory_space<vmem>>, vector<16x64xf32>,
    } else {
    }
    return
  }
  func.func @transform_0(%arg0: i32, %arg1: i32) -> (i32, i32, i32) {
    %c0_i32 = arith.constant 0 : i32
    %c0_i32_0 = arith.constant 0 : i32
    return %arg1, %arg0, %c0_i32 : i32, i32, i32
  }
  func.func @transform_1(%arg0: i32, %arg1: i32) -> (i32, i32) {
    %c0_i32 = arith.constant 0 : i32
    %c0_i32_0 = arith.constant 0 : i32
    %c0_i32_1 = arith.constant 0 : i32
    return %c0_i32, %c0_i32_0 : i32, i32
  }
  func.func @transform_2(%arg0: i32, %arg1: i32) -> (i32, i32) {
    %c0_i32 = arith.constant 0 : i32
    %c0_i32_0 = arith.constant 0 : i32
    %c0_i32_1 = arith.constant 0 : i32
    return %c0_i32, %c0_i32_0 : i32, i32
  }
  func.func @transform_3(%arg0: i32, %arg1: i32) -> (i32, i32) {
    %c0_i32 = arith.constant 0 : i32
    %c0_i32_0 = arith.constant 0 : i32
    %c0_i32_1 = arith.constant 0 : i32
    return %c0_i32, %c0_i32_0 : i32, i32
  }
  func.func @transform_4(%arg0: i32, %arg1: i32) -> (i32, i32) {
    %c0_i32 = arith.constant 0 : i32
    %c0_i32_0 = arith.constant 0 : i32
    %c0_i32_1 = arith.constant 0 : i32
    return %c0_i32, %c0_i32_0 : i32, i32
  }
  func.func @transform_5(%arg0: i32, %arg1: i32) -> (i32, i32) {
    %c0_i32 = arith.constant 0 : i32
    %c0_i32_0 = arith.constant 0 : i32
    %c0_i32_1 = arith.constant 0 : i32
    return %c0_i32, %c0_i32_0 : i32, i32
  }
  func.func @transform_6(%arg0: i32, %arg1: i32) -> (i32, i32) {
    %c0_i32 = arith.constant 0 : i32
    %c0_i32_0 = arith.constant 0 : i32
    %c0_i32_1 = arith.constant 0 : i32
    return %c0_i32, %c0_i32_0 : i32, i32
  }
  func.func @transform_7(%arg0: i32, %arg1: i32) -> (i32, i32) {
    %c0_i32 = arith.constant 0 : i32
    %c0_i32_0 = arith.constant 0 : i32
    %c0_i32_1 = arith.constant 0 : i32
    return %c0_i32, %c0_i32_0 : i32, i32
  }
  func.func @transform_8(%arg0: i32, %arg1: i32) -> (i32, i32) {
    %c0_i32 = arith.constant 0 : i32
    %c0_i32_0 = arith.constant 0 : i32
    %c0_i32_1 = arith.constant 0 : i32
    return %c0_i32, %c0_i32_0 : i32, i32
  }
  func.func @transform_9(%arg0: i32, %arg1: i32) -> (i32, i32) {
    %c0_i32 = arith.constant 0 : i32
    %c0_i32_0 = arith.constant 0 : i32
    %c0_i32_1 = arith.constant 0 : i32
    return %c0_i32, %c0_i32_0 : i32, i32
  }
  func.func @transform_10(%arg0: i32, %arg1: i32) -> (i32, i32) {
    %c0_i32 = arith.constant 0 : i32
    %c0_i32_0 = arith.constant 0 : i32
    return %arg0, %c0_i32 : i32, i32
  }
}

</mosaic_0001>

<bundles_post_ra>
// kernel: tpu_custom_call.1
= control target key start
LH: loop header
LB: loop body
LE: loop exit
PB: predicated region body
PF: predicated region fallthrough
CT: control target
= control target key end

     0   :  { %s3160_s0 = inlined_call_operand.hbm [shape: bf16[8,16,16], index: 0, kind: input, shape index: {}]   ;;  %s3161_s1 = inlined_call_operand.hbm [shape: bf16[16,128], index: 1, kind: input, shape index: {}]   ;;  %s3162_s2 = inlined_call_operand.hbm [shape: f32[32,128], index: 2, kind: input, shape index: {}]   ;;  %s3163_s3 = inlined_call_operand.vmem [shape: f32[1,128], index: 3, kind: input, shape index: {}]   ;;  %s3164_s4 = inlined_call_operand.hbm [shape: bf16[16,128], index: 4, kind: input, shape index: {}]   ;;  %s3165_s5 = inlined_call_operand.vmem [shape: f32[1,128], index: 5, kind: input, shape index: {}]   ;;  %s3166_s6 = inlined_call_operand.hbm [shape: f32[32,32], index: 6, kind: input, shape index: {}]   ;;  %s3167_s7 = inlined_call_operand.hbm [shape: f32[32,32], index: 7, kind: input, shape index: {}]   ;;  %s3168_s8 = inlined_call_operand.hbm [shape: f32[32,32], index: 8, kind: input, shape index: {}]   ;;  %s3169_s9 = inlined_call_operand.vmem [shape: f32[32,32], index: 9, kind: input, shape index: {}]   ;;  %s3170_s10 = inlined_call_operand.hbm [shape: f32[16,64], index: 10, kind: output, shape index: {}]  }
   0x1   :  { %3179 = sst [smem:[#allocation23_spill]] %s3161_s1 }
   0x2   :  { %3180 = sst [smem:[#allocation24_spill]] %s3165_s5 }
   0x3   :  { %3181 = sst [smem:[#allocation25_spill]] %s3169_s9 }
   0x4   :  { %3182 = sst [smem:[#allocation26_spill]] %s3170_s10 }
   0x5   :  { %15 = vsyncpa [#allocation6], 0 }
   0x6   :  { %17 = vsyncpa [#allocation6 + $0x1], 0 }
   0x7   :  { %18 = vsyncpa [#allocation9], 0 }
   0x8   :  { %19 = vsyncpa [#allocation12], 0 }
   0x9   :  { %20 = vsyncpa [#allocation15], 0 }
   0xa   :  { %21 = vsyncpa [#allocation7], 0  ;;  %s2685_s13 = smov 0   ;;  %s2687_s14 = smov 0  }
   0xb   :  { %s2689_s15 = smov 0   ;;  %s2691_s16 = smov 0  }
   0xc   :  { %s2693_s17 = smov 0   ;;  %s2695_s18 = smov 0  }
   0xd LB: > { %s3174_s19 = sadd.s32 4294967295, %s2605_s18   ;;  %p1793_p0 = scmp.ge.s32.totalorder %s2605_s18, 1  ;;  %s2605_s18 = sphi %s2695_s18, %s27_s18   ;;  %s2601_s17 = sphi %s2693_s17, %s3205_s17   ;;  %s2597_s16 = sphi %s2691_s16, %s3204_s16   ;;  %s2593_s15 = sphi %s2689_s15, %s3203_s15   ;;  %s2589_s14 = sphi %s2687_s14, %s3202_s14   ;;  %s2585_s13 = sphi %s2685_s13, %s3201_s13  }
   0xe   : > { %p2719_p1 = scmp.eq.s32.totalorder %s3174_s19, 0  ;;  %p287_p2 = scmp.lt.s32.totalorder %s2605_s18, 3 }
   0xf   : > { %s2607_s22 = smov [#allocation8]   ;;  %s2608_s25 = smov [#allocation11]  }
  0x10   : > { %s3183_s20 = scalar_select %p2719_p1, 1, 0 }
  0x11   : > { %p2724_p3 = pnand %p1793_p0, %p287_p2  ;;  %s299_s23 = sshll.u32 %s2607_s22, 4  ;;  %s300_s23 = int_to_ptr.vmem [resolvable:$true] %s299_s23 }
  0x12   : > { %s328_s26 = sshll.u32 %s2608_s25, 4  ;;  %s3186_s1 = sld [smem:[#allocation23_spill]]  ;;  %s2736_s26 = int_to_ptr.vmem [resolvable:$true] %s328_s26 }
  0x13   : > { %s3184_s21 = scalar_select %p2724_p3, 1, 0 }
  0x14   : > { %p2120_p4 = pneg %p2724_p3 }
  0x16   : > { %p2732_p5 = pnand %p2120_p4, %p2719_p1 }
  0x18   : > { %s2315_s29 = scalar_lea.hbm %s3186_s1, 128  ;;  %p2746_p7 = pneg %p2732_p5 }
  0x19   : > { %p2316_p6 = scmp.ne.s32.totalorder %s3186_s1, %s2315_s29  ;;  %p2322_p10 = scmp.lt.u32.totalorder %s2315_s29, %s3186_s1 }
  0x1b   : > { %p2318_p8 = pnand %p2746_p7, %p2316_p6 }
  0x1d   : > { %p2319_p9 = pneg %p2318_p8 }
  0x1f   : > { %p2324_p11 = pnand %p2322_p10, %p2319_p9 }
  0x21   : > { %2327 = shalt.err (!%p2324_p11)
}
  0x22   : > { %s2328_s27 = scalar_lea.vmem %s300_s23, 128  ;;  %p2336_p2 = scmp.lt.s32.totalorder %s300_s23, %s300_s23 }
  0x23   : > { %p2329_p12 = scmp.ne.s32.totalorder %s300_s23, %s2328_s27  ;;  %p2337_p4 = scmp.lt.s32.totalorder %s2328_s27, %s2328_s27 }
  0x25   : > { %p2331_p13 = pnand %p2329_p12, %p2746_p7  ;;  %p2338_p3 = por %p2337_p4, %p2336_p2 }
  0x27   : > { %p2332_p0 = pneg %p2331_p13 }
  0x29   : > { %p2339_p1 = pnand %p2338_p3, %p2332_p0 }
  0x2b   : > { %2342 = shalt.err (!%p2339_p1)
}
  0x2c   : > { %s3177_s28 = smov 64   ;;  %s3178_s30 = smov 4  }
  0x2d   : > { %2123 = dma.hbm_to_vmem [thread:$0]  (!%p2732_p5), %s3186_s1, 128, %s300_s23, [#allocation9], %s3177_s28, %s3177_s28, %s3178_s30  }
  0x2e   : > { %s2343_s19 = scalar_lea.hbm %s3164_s4, 128 }
  0x2f   : > { %p2344_p1 = scmp.ne.s32.totalorder %s3164_s4, %s2343_s19  ;;  %p2350_p8 = scmp.lt.u32.totalorder %s2343_s19, %s3164_s4 }
  0x31   : > { %p2346_p3 = pnand %p2344_p1, %p2746_p7 }
  0x33   : > { %p2347_p6 = pneg %p2346_p3 }
  0x35   : > { %p2352_p9 = pnand %p2350_p8, %p2347_p6 }
  0x37   : > { %2355 = shalt.err (!%p2352_p9)
}
  0x38   : > { %s2356_s23 = scalar_lea.vmem %s2736_s26, 128  ;;  %p2364_p13 = scmp.lt.s32.totalorder %s2736_s26, %s2736_s26 }
  0x39   : > { %p2357_p10 = scmp.ne.s32.totalorder %s2736_s26, %s2356_s23  ;;  %p2365_p0 = scmp.lt.s32.totalorder %s2356_s23, %s2356_s23 }
  0x3b   : > { %p2359_p11 = pnand %p2357_p10, %p2746_p7  ;;  %p2366_p2 = por %p2365_p0, %p2364_p13 }
  0x3d   : > { %p2360_p12 = pneg %p2359_p11 }
  0x3f   : > { %p2367_p4 = pnand %p2366_p2, %p2360_p12 }
  0x41   : > { %2370 = shalt.err (!%p2367_p4)
}
  0x42   : > { %2129 = dma.hbm_to_vmem [thread:$0]  (!%p2732_p5), %s3164_s4, 128, %s2736_s26, [#allocation12], %s3177_s28, %s3177_s28, %s3178_s30  }
  0x43   : > { %s2611_s10 = smov [#allocation14]   ;;  %s2612_s29 = smov [#allocation10]  }
  0x44   : > { %s357_s19 = sshll.u32 %s2611_s10, 4  ;;  %s312_s11 = sshll.u32 %s2612_s29, 4  ;;  %s358_s19 = int_to_ptr.vmem [resolvable:$true] %s357_s19  ;;  %s2791_s11 = int_to_ptr.vmem [resolvable:$true] %s312_s11 }
  0x45   : > { %s2371_s27 = scalar_lea.hbm %s3167_s7, 512 }
  0x46   : > { %p2372_p1 = scmp.ne.s32.totalorder %s3167_s7, %s2371_s27  ;;  %p2378_p8 = scmp.lt.u32.totalorder %s2371_s27, %s3167_s7 }
  0x48   : > { %p2374_p3 = pnand %p2372_p1, %p2746_p7 }
  0x4a   : > { %p2375_p6 = pneg %p2374_p3 }
  0x4c   : > { %p2380_p9 = pnand %p2378_p8, %p2375_p6 }
  0x4e   : > { %2383 = shalt.err (!%p2380_p9)
}
  0x4f   : > { %s2384_s9 = scalar_lea.vmem %s358_s19, 512  ;;  %p2392_p13 = scmp.lt.s32.totalorder %s358_s19, %s358_s19 }
  0x50   : > { %p2385_p10 = scmp.ne.s32.totalorder %s358_s19, %s2384_s9  ;;  %p2393_p0 = scmp.lt.s32.totalorder %s2384_s9, %s2384_s9 }
  0x52   : > { %p2387_p11 = pnand %p2385_p10, %p2746_p7  ;;  %p2394_p2 = por %p2393_p0, %p2392_p13 }
  0x54   : > { %p2388_p12 = pneg %p2387_p11 }
  0x56   : > { %p2395_p4 = pnand %p2394_p2, %p2388_p12 }
  0x58   : > { %2398 = shalt.err (!%p2395_p4)
}
  0x59   : > { %s2613_s1 = smov 128   ;;  %s2614_s10 = smov 8  }
  0x5a   : > { %2135 = dma.hbm_to_vmem [thread:$0]  (!%p2732_p5), %s3167_s7, 512, %s358_s19, [#allocation15], %s2613_s1, %s2613_s1, %s2614_s10  }
  0x5b   : > { %s2399_s23 = scalar_lea.hbm %s3162_s2, 512 }
  0x5c   : > { %p2400_p1 = scmp.ne.s32.totalorder %s3162_s2, %s2399_s23  ;;  %p2406_p8 = scmp.lt.u32.totalorder %s2399_s23, %s3162_s2 }
  0x5e   : > { %p2402_p3 = pnand %p2400_p1, %p2746_p7 }
  0x60   : > { %p2403_p6 = pneg %p2402_p3 }
  0x62   : > { %p2408_p9 = pnand %p2406_p8, %p2403_p6 }
  0x64   : > { %2411 = shalt.err (!%p2408_p9)
}
  0x65   : > { %s2412_s19 = scalar_lea.vmem %s2791_s11, 512  ;;  %p2420_p13 = scmp.lt.s32.totalorder %s2791_s11, %s2791_s11 }
  0x66   : > { %p2413_p10 = scmp.ne.s32.totalorder %s2791_s11, %s2412_s19  ;;  %p2421_p0 = scmp.lt.s32.totalorder %s2412_s19, %s2412_s19 }
  0x68   : > { %p2415_p11 = pnand %p2413_p10, %p2746_p7  ;;  %p2422_p2 = por %p2421_p0, %p2420_p13 }
  0x6a   : > { %p2416_p12 = pneg %p2415_p11 }
  0x6c   : > { %p2423_p4 = pnand %p2422_p2, %p2416_p12 }
  0x6e   : > { %2426 = shalt.err (!%p2423_p4)
}
  0x6f   : > { %2126 = dma.hbm_to_vmem [thread:$0]  (!%p2732_p5), %s3162_s2, 512, %s2791_s11, [#allocation9], %s2613_s1, %s2613_s1, %s2614_s10  }
  0x70   : > { %s2615_s22 = smov [#allocation13]   ;;  %s2616_s27 = smov [#allocation16]  }
  0x71   : > { %s344_s25 = sshll.u32 %s2615_s22, 4  ;;  %s370_s23 = sshll.u32 %s2616_s27, 4  ;;  %s345_s25 = int_to_ptr.vmem [resolvable:$true] %s344_s25  ;;  %s2840_s23 = int_to_ptr.vmem [resolvable:$true] %s370_s23 }
  0x72   : > { %s2427_s9 = scalar_lea.hbm %s3166_s6, 512 }
  0x73   : > { %p2428_p1 = scmp.ne.s32.totalorder %s3166_s6, %s2427_s9  ;;  %p2434_p8 = scmp.lt.u32.totalorder %s2427_s9, %s3166_s6 }
  0x75   : > { %p2430_p3 = pnand %p2428_p1, %p2746_p7 }
  0x77   : > { %p2431_p6 = pneg %p2430_p3 }
  0x79   : > { %p2436_p9 = pnand %p2434_p8, %p2431_p6 }
  0x7b   : > { %2439 = shalt.err (!%p2436_p9)
}
  0x7c   : > { %s2440_s29 = scalar_lea.vmem %s345_s25, 512  ;;  %p2448_p13 = scmp.lt.s32.totalorder %s345_s25, %s345_s25 }
  0x7d   : > { %p2441_p10 = scmp.ne.s32.totalorder %s345_s25, %s2440_s29  ;;  %p2449_p0 = scmp.lt.s32.totalorder %s2440_s29, %s2440_s29 }
  0x7f   : > { %p2443_p11 = pnand %p2441_p10, %p2746_p7  ;;  %p2450_p2 = por %p2449_p0, %p2448_p13 }
  0x81   : > { %p2444_p12 = pneg %p2443_p11 }
  0x83   : > { %p2451_p4 = pnand %p2450_p2, %p2444_p12 }
  0x85   : > { %2454 = shalt.err (!%p2451_p4)
}
  0x86   : > { %2132 = dma.hbm_to_vmem [thread:$0]  (!%p2732_p5), %s3166_s6, 512, %s345_s25, [#allocation12], %s2613_s1, %s2613_s1, %s2614_s10  }
  0x87   : > { %s2455_s26 = scalar_lea.hbm %s3168_s8, 512 }
  0x88   : > { %p2456_p1 = scmp.ne.s32.totalorder %s3168_s8, %s2455_s26  ;;  %p2462_p8 = scmp.lt.u32.totalorder %s2455_s26, %s3168_s8 }
  0x8a   : > { %p2458_p3 = pnand %p2456_p1, %p2746_p7 }
  0x8c   : > { %p2459_p6 = pneg %p2458_p3 }
  0x8e   : > { %p2464_p9 = pnand %p2462_p8, %p2459_p6 }
  0x90   : > { %2467 = shalt.err (!%p2464_p9)
}
  0x91   : > { %s2468_s25 = scalar_lea.vmem %s2840_s23, 512  ;;  %p2476_p13 = scmp.lt.s32.totalorder %s2840_s23, %s2840_s23 }
  0x92   : > { %p2469_p10 = scmp.ne.s32.totalorder %s2840_s23, %s2468_s25  ;;  %p2477_p0 = scmp.lt.s32.totalorder %s2468_s25, %s2468_s25 }
  0x94   : > { %p2471_p11 = pnand %p2469_p10, %p2746_p7  ;;  %p2478_p2 = por %p2477_p0, %p2476_p13 }
  0x96   : > { %p2472_p12 = pneg %p2471_p11 }
  0x98   : > { %p2479_p4 = pnand %p2478_p2, %p2472_p12 }
  0x9a   : > { %2482 = shalt.err (!%p2479_p4)
}
  0x9b   : > { %2138 = dma.hbm_to_vmem [thread:$0]  (!%p2732_p5), %s3168_s8, 512, %s2840_s23, [#allocation15], %s2613_s1, %s2613_s1, %s2614_s10  }
  0x9c   : > { %s36_s24 = sadd.s32 1, %s2601_s17  ;;  %s48_s12 = sadd.s32 1, %s2593_s15 }
  0x9d   : > { %p37_p7 = scmp.ge.s32.totalorder %s36_s24, 2  ;;  %p55_p1 = scmp.ne.s32.totalorder %s2593_s15, %s2589_s14 }
  0x9e   : > { %p56_p3 = scmp.eq.s32.totalorder %s2605_s18, 0  ;;  %p61_p6 = scmp.ne.s32.totalorder %s2589_s14, %s2585_s13 }
  0x9f   : > { %s3207_s24 = smov (%p37_p7, %s36_s24), 0  ;;  %p3189_p9 = scmp.ne.s32.totalorder %s3183_s20, 0 }
  0xa0   : > { %p2898_p8 = por %p56_p3, %p55_p1  ;;  %s43_s1 = ssub.s32 %s2601_s17, %s3207_s24 }
  0xa1   : > { %p2904_p10 = por %p3189_p9, %p61_p6  ;;  %p2149_p5 = scmp.lt.s32.totalorder %s2605_s18, 2 }
  0xa2   : > { %p46_p11 = scmp.eq.s32.totalorder %s43_s1, 0  ;;  %s387_s10 = sand.u32 1, %s2593_s15  }
  0xa3   : > { %s1801_s23 = sshll.u32 %s387_s10, 5  ;;  %s1862_s13 = sshll.u32 %s2601_s17, 9 }
  0xa4   : > { %s2913_s5 = scalar_select %p46_p11, %s2593_s15, %s48_s12  }
  0xa5   : > { %s2919_s19 = scalar_lea.hbm %s3160_s0, %s1862_s13  ;;  %s391_s28 = scalar_lea.vmem [#allocation5], %s1801_s23 }
  0xa6   : > { %s401_s11 = sshll.u32 %s391_s28, 4  ;;  %p2925_p12 = pnand %p2149_p5, %p2898_p8  ;;  %s2921_s11 = int_to_ptr.vmem [resolvable:$true] %s401_s11 }
  0xa7   : > { %s2929_s29 = scalar_lea.sflag [#allocation6], %s387_s10  ;;  %s2483_s30 = scalar_lea.hbm %s2919_s19, 512 }
  0xa8   : > { %p2484_p13 = scmp.ne.s32.totalorder %s2919_s19, %s2483_s30  ;;  %p2485_p0 = pneg %p2925_p12 }
  0xa9   : > { %s2488_s22 = scalar_lea.hbm %s3160_s0, 1024  ;;  %p2489_p7 = scmp.lt.u32.totalorder %s2919_s19, %s3160_s0 }
  0xaa   : > { %p2486_p2 = pnand %p2485_p0, %p2484_p13  ;;  %p2490_p1 = scmp.lt.u32.totalorder %s2488_s22, %s2483_s30 }
  0xab   : > { %p2492_p6 = scmp.lt.u32.totalorder %s2483_s30, %s2919_s19 }
  0xac   : > { %p2487_p4 = pneg %p2486_p2  ;;  %p2491_p3 = por %p2490_p1, %p2489_p7 }
  0xae   : > { %p2493_p8 = por %p2492_p6, %p2491_p3 }
  0xb0   : > { %p2494_p9 = pnand %p2493_p8, %p2487_p4 }
  0xb2   : > { %2497 = shalt.err (!%p2494_p9)
}
  0xb3   : > { %s2498_s10 = scalar_lea.vmem %s2921_s11, 512  ;;  %s2617_s26 = smov [#allocation5]  }
  0xb4   : > { %p2499_p5 = scmp.ne.s32.totalorder %s2921_s11, %s2498_s10  ;;  %s2503_s9 = sshll.u32 %s2617_s26, 4  ;;  %s2504_s9 = int_to_ptr.vmem [resolvable:$false] %s2503_s9 }
  0xb5   : > { %s2505_s28 = scalar_lea.vmem %s2504_s9, 1024  ;;  %p2506_p2 = scmp.lt.s32.totalorder %s2921_s11, %s2504_s9 }
  0xb6   : > { %p2501_p11 = pnand %p2499_p5, %p2485_p0  ;;  %p2507_p7 = scmp.lt.s32.totalorder %s2505_s28, %s2498_s10 }
  0xb8   : > { %p2502_p13 = pneg %p2501_p11  ;;  %p2508_p1 = por %p2507_p7, %p2506_p2 }
  0xba   : > { %p2509_p3 = pnand %p2508_p1, %p2502_p13 }
  0xbc   : > { %2512 = shalt.err (!%p2509_p3)
}
  0xbd   : > { %s3192_s30 = smov 4   ;;  %s3193_s12 = smov 64  }
  0xbe   : > { %2142 = dma.hbm_to_vmem [thread:$0]  (!%p2925_p12), %s2919_s19, 512, %s2921_s11, %s2929_s29, %s3193_s12, %s3193_s12, %s3192_s30  }
  0xbf   : > { %p3194_p0 = scmp.ne.s32.totalorder %s3184_s21, 0 }
  0xc0   : > { %s415_s1 = sand.u32 (!%p3194_p0), 1, %s2589_s14  }
  0xc1   : > { %413 = sbr.rel (%p3194_p0) target bundleno = 3675 (0xe5b), region = 60  ;;  %s1806_s22 = sshll.u32 (!%p3194_p0), %s415_s1, 5 }
  0xc2   : > { %s416_s23 = scalar_lea.sflag (!%p3194_p0), [#allocation6], %s415_s1  ;;  %s2963_s13 = scalar_lea.vmem (!%p3194_p0), [#allocation5], %s1806_s22 }
  0xc8   : > { %2564 = dma.done.wait (%p2904_p10), %s416_s23, 512  }
  0xc9   : > { %2566 = vsyncadd (%p2904_p10), %s416_s23, 4294966784  ;;  %p3195_p4 = scmp.ne.s32.totalorder %s3183_s20, 0 }
  0xcb   : > { %2568 = dma.done.wait (%p3195_p4), [#allocation9], 640  }
  0xcc   : > { %2570 = vsyncadd (%p3195_p4), [#allocation9], 4294966656 }
  0xcd   : > { %2572 = dma.done.wait (%p3195_p4), [#allocation12], 640  }
  0xce   : > { %2574 = vsyncadd (%p3195_p4), [#allocation12], 4294966656 }
  0xcf   : > { %2576 = dma.done.wait (%p3195_p4), [#allocation15], 1024  }
  0xd0   : > { %2578 = vsyncadd (%p3195_p4), [#allocation15], 4294966272  ;;  %p1813_p10 = scmp.ne.s32.totalorder %s2597_s16, 0 }
  0xd1   : > { %vm483_vm0 = vcmask (!%p1813_p10), 261120   ;;  %v2618_v0 = vmov (!%p1813_p10), 0.0  }
  0xd2   : > { %482 = sbr.rel (%p1813_p10) target bundleno = 217 (0xd9), region = 92  ;;  %484 = vst.msk [vmem:[#allocation3] sm:$0xff] (!%p1813_p10), %vm483_vm0, %v2618_v0  ;;  %485 = vst.msk [vmem:[#allocation3 + $0x8] sm:$0xff] (!%p1813_p10), %vm483_vm0, %v2618_v0 }
  0xd3   : > { %486 = vst.msk [vmem:[#allocation4] sm:$0xff] (!%p1813_p10), %vm483_vm0, %v2618_v0  ;;  %487 = vst.msk [vmem:[#allocation4 + $0x8] sm:$0xff] (!%p1813_p10), %vm483_vm0, %v2618_v0 }
  0xd9 PF: > { %v2228_v1 = vld [vmem:[#allocation8] sm:$0xff]   ;;  %v617_v2 = vld [vmem:[#allocation10] sm:$0xff]  ;;  %v618_v3 = vld [vmem:[#allocation10 + $0x8] sm:$0xff]  ;;  %vm531_vm1 = vcmask 130048   ;;  %vm627_vm2 = vcmask 261120   ;;  %s2619_s20 = smov 32  }
  0xda   : > { %1918 = vmatprep.subr.bf16.mxu0 %v2228_v1  ;;  %v2982_v4 = vpack.c.bf16 %v618_v3, %v617_v2  ;;  %v2229_v5 = vld [vmem:[%s2963_s13] sm:$0xff]   ;;  %v2230_v6 = vld [vmem:[%s2963_s13 + $0x8] sm:$0xff]   ;;  %v619_v7 = vld [vmem:[#allocation10 + $0x10] sm:$0xff]  ;;  %s2620_s19 = smov 64   ;;  %s2621_s11 = smov 96  }
  0xdb   : > { %1919 = vmatpush3.bf16.msra.mxu0 %v2228_v1  ;;  %1920 = vmatprep.mubr.msk.bf16.mxu0 %vm531_vm1, %v2229_v5  ;;  %v620_v8 = vld [vmem:[#allocation10 + $0x18] sm:$0xff]  ;;  %v623_v11 = vld [vmem:[#allocation4] sm:$0xff]  ;;  %v624_v12 = vld [vmem:[#allocation4 + $0x8] sm:$0xff]  ;;  %p1840_p12 = scmp.ne.s32.totalorder %s2597_s16, 1 }
  0xdc   : > { %2023 = vmatprep.subr.bf16.mxu1 %v2982_v4  ;;  %v621_v9 = vld [vmem:[#allocation3] sm:$0xff]  ;;  %v2989_v10 = vpack.c.bf16 %v620_v8, %v619_v7  ;;  %727 = vrot.lane.b32.xlu1 %v623_v11, %s2619_s20  ;;  %v622_v13 = vld [vmem:[#allocation3 + $0x8] sm:$0xff]  ;;  %vm2623_vm3 = vmmov (!%p1840_p12), 0   ;;  %s3196_s10 = sld [smem:[#allocation24_spill]] (!%p1840_p12)  ;;  %s2624_s16 = smov (!%p1840_p12), 64   ;;  %vm1656_vm4 = vcmask (!%p1840_p12), 523264  }
  0xdd   : > { %2025 = vmatpush3.bf16.msra.mxu1 %v2982_v4  ;;  %1936 = vmatprep.mubr.msk.f32.mxu1 %vm627_vm2, %v621_v9  ;;  %v3012_v15 = vld [vmem:[%s3163_s3] ss:$0 sm:$0xff]  ;;  %s3197_s28 = sld [smem:[#allocation25_spill]] (!%p1840_p12)  ;;  %s2625_s1 = smov (!%p1840_p12), 96  }
  0xde   : > { %1921 = vmatmul.mubr.msk.bf16.vlgmr.msra.gmra.mrb[0].mxu0 %vm531_vm1, %v2230_v6  ;;  %2027 = vmatprep.subr.bf16.mxu1 %v2989_v10  ;;  %s2626_s21 = smov (!%p1840_p12), 32  }
  0xdf   : > { %2039 = vmatprep.subr.bf16.mxu0 %v2982_v4 }
  0xe0   : > { %2041 = vmatpush3.bf16.msra.mxu0 %v2982_v4  ;;  %729 = vrot.lane.b32.xlu1 %v624_v12, %s2619_s20 }
  0xe1   : > { %2029 = vmatpush3.bf16.msra.mxu1 %v2989_v10  ;;  %2043 = vmatprep.subr.bf16.mxu0 %v2989_v10 }
  0xe2   : > { %2031 = vmatprep.subr.bf16.mxu1 %v2982_v4 }
  0xe4   : > { %1937 = vmatmul.mubr.msk.f32.vlgmr.msra.gmra.mrb[0].mxu1 %vm627_vm2, %v622_v13  ;;  %2045 = vmatpush3.bf16.msra.mxu0 %v2989_v10 }
  0xe5   : > { %2033 = vmatpush3.bf16.msra.mxu1 %v2982_v4 }
  0xe6   : > { %2035 = vmatprep.subr.bf16.mxu1 %v2989_v10 }
  0xe9   : > { %2037 = vmatpush3.bf16.msra.mxu1 %v2989_v10 }
  0xea   : > { %2047 = vmatprep.subr.bf16.mxu1 %v2982_v4 }
 0x14e   : > { %v728_v39 = vpop.permute.xlu1 %727 }
 0x152   : > { %v730_v41 = vpop.permute.xlu1 %729 }
 0x1b1   : > { %v3007_v14 = vpop.f32.mrb[0].mxu0 }
 0x1b2   : > { %v578_v16 = vpop.f32.mrb[1].mxu0  ;;  %v587_v56 = vadd.f32 %v3007_v14, %v3012_v15 }
 0x1b3   : > { %v1923_v17 = vpop.f32.mrb[2].mxu0  ;;  %v579_v19 = vadd.f32 %v3012_v15, %v578_v16 }
 0x1b4   : > { %v581_v18 = vpop.f32.mrb[3].mxu0  ;;  %v590_v55 = vadd.f32 %v1923_v17, %v3012_v15 }
 0x1b5   : > { %v582_v20 = vadd.f32 %v3012_v15, %v581_v18  ;;  %v2231_v18 = vld [vmem:[%s2963_s13 + $0x10] sm:$0xff]  }
 0x1b6   : > { %1924 = vmatprep.mubr.msk.bf16.mxu0 %vm531_vm1, %v2231_v18 }
 0x1b7   : > { %v1938_v21 = vpop.f32.mrb[0].mxu1 }
 0x1b8   : > { %v710_v22 = vadd.f32 %v1938_v21, %v582_v20  ;;  %v700_v23 = vpop.f32.mrb[1].mxu1 }
 0x1b9   : > { %v709_v24 = vadd.f32 %v700_v23, %v579_v19  ;;  %v2232_v19 = vld [vmem:[%s2963_s13 + $0x18] sm:$0xff]  }
 0x1ba   : > { %v1827_v28 = vmul.f32 -1.442695, %v710_v22  ;;  %1925 = vmatmul.mubr.msk.bf16.gmra.mrb[4].mxu0 %vm531_vm1, %v2232_v19 }
 0x1bb   : > { %2233 = vtanh.f32 %v709_v24  ;;  %v1826_v27 = vmul.f32 -1.442695, %v709_v24 }
 0x1bc   : > { %2235 = vtanh.f32 %v710_v22 }
 0x1bd   : > { %2237 = vpow2.f32 %v1826_v27 }
 0x1be   : > { %2239 = vpow2.f32 %v1827_v28 }
 0x1c5   : > { %v2234_v25 = vpop.eup %2233 }
 0x1c6   : > { %737 = vrot.lane.b32.xlu0 %v2234_v25, %s2620_s19  ;;  %v2236_v26 = vpop.eup %2235 }
 0x1c7   : > { %v2238_v29 = vpop.eup %2237 }
 0x1c8   : > { %v717_v30 = vadd.f32 1.0, %v2238_v29  ;;  %v2240_v31 = vpop.eup %2239 }
 0x1c9   : > { %v718_v32 = vadd.f32 1.0, %v2240_v31 }
 0x1ca   : > { %739 = vrot.lane.b32.xlu0 %v2236_v26, %s2620_s19  ;;  %2241 = vrcp.f32 %v717_v30 }
 0x1cb   : > { %2243 = vrcp.f32 %v718_v32 }
 0x1d4   : > { %v2242_v33 = vpop.eup %2241 }
 0x1d5   : > { %v2244_v36 = vpop.eup %2243  ;;  %v733_v40 = vmul.f32 %v2242_v33, %v728_v39 }
 0x1d6   : > { %v734_v44 = vmul.f32 %v2244_v36, %v730_v41 }
 0x238   : > { %v738_v34 = vpop.permute.xlu0 %737 }
 0x239   : > { %v743_v35 = vmul.f32 %v2242_v33, %v738_v34 }
 0x23b   : > { %747 = vrot.lane.b32.xlu0 %v743_v35, %s2619_s20 }
 0x23c   : > { %v740_v37 = vpop.permute.xlu0 %739 }
 0x23d   : > { %v744_v38 = vmul.f32 %v2244_v36, %v740_v37 }
 0x23f   : > { %749 = vrot.lane.b32.xlu1 %v744_v38, %s2619_s20 }
 0x28d   : > { %v1926_v26 = vpop.f32.mrb[4].mxu0 }
 0x28e   : > { %v594_v27 = vpop.f32.mrb[5].mxu0 }
 0x28f   : > { %v1927_v28 = vpop.f32.mrb[6].mxu0 }
 0x290   : > { %v597_v29 = vpop.f32.mrb[7].mxu0 }
 0x291   : > { %v598_v32 = vadd.f32 %v3012_v15, %v597_v29 }
 0x2ad   : > { %v748_v42 = vpop.permute.xlu0 %747 }
 0x2ae   : > { %v753_v43 = vadd.f32 %v748_v42, %v733_v40 }
 0x2b0   : > { %2245 = vtanh.f32 %v753_v43 }
 0x2b1   : > { %v750_v45 = vpop.permute.xlu1 %749 }
 0x2b2   : > { %v754_v46 = vadd.f32 %v750_v45, %v734_v44 }
 0x2b4   : > { %2247 = vtanh.f32 %v754_v46 }
 0x2ba   : > { %v2246_v47 = vpop.eup %2245 }
 0x2bb   : > { %759 = vrot.lane.b32.xlu0 %v2246_v47, %s2620_s19 }
 0x2be   : > { %v2248_v48 = vpop.eup %2247 }
 0x2bf   : > { %761 = vrot.lane.b32.xlu1 %v2248_v48, %s2620_s19 }
 0x32d   : > { %v760_v49 = vpop.permute.xlu0 %759 }
 0x32e   : > { %v765_v50 = vmul.f32 %v2242_v33, %v760_v49  ;;  %v595_v33 = vadd.f32 %v3012_v15, %v594_v27 }
 0x330   : > { %772 = vrot.lane.b32.xlu0 %v765_v50, %s2619_s20 }
 0x331   : > { %v762_v51 = vpop.permute.xlu1 %761 }
 0x332   : > { %v766_v52 = vmul.f32 %v2244_v36, %v762_v51 }
 0x334   : > { %774 = vrot.lane.b32.xlu1 %v766_v52, %s2619_s20 }
 0x3a2   : > { %v773_v53 = vpop.permute.xlu0 %772 }
 0x3a3   : > { %1947 = vmatprep.mubr.msk.f32.mxu1 %vm627_vm2, %v773_v53 }
 0x3a6   : > { %v775_v54 = vpop.permute.xlu1 %774 }
 0x3a7   : > { %1948 = vmatmul.mubr.msk.f32.vlgmr.msra.gmra.mrb[2].mxu1 %vm627_vm2, %v775_v54 }
 0x3a8   : > { %2049 = vmatpush3.bf16.msra.mxu1 %v2982_v4 }
 0x3a9   : > { %2051 = vmatprep.subr.bf16.mxu1 %v2989_v10 }
 0x3ac   : > { %2053 = vmatpush3.bf16.msra.mxu1 %v2989_v10 }
 0x47a   : > { %v1949_v57 = vpop.f32.mrb[2].mxu1 }
 0x47b   : > { %v856_v58 = vadd.f32 %v1949_v57, %v590_v55  ;;  %v846_v59 = vpop.f32.mrb[3].mxu1 }
 0x47c   : > { %v855_v60 = vadd.f32 %v846_v59, %v587_v56 }
 0x47d   : > { %2249 = vtanh.f32 %v856_v58  ;;  %v1831_v63 = vmul.f32 -1.442695, %v856_v58 }
 0x47e   : > { %2251 = vtanh.f32 %v855_v60  ;;  %v1830_v0 = vmul.f32 -1.442695, %v855_v60 }
 0x47f   : > { %2253 = vpow2.f32 %v1831_v63 }
 0x480   : > { %2255 = vpow2.f32 %v1830_v0 }
 0x487   : > { %v2250_v61 = vpop.eup %2249 }
 0x488   : > { %v2252_v62 = vpop.eup %2251  ;;  %877 = vrot.lane.b32.xlu1 %v2250_v61, %s2620_s19 }
 0x489   : > { %875 = vrot.lane.b32.xlu0 %v2252_v62, %s2620_s19  ;;  %v2254_v1 = vpop.eup %2253 }
 0x48a   : > { %v2256_v2 = vpop.eup %2255  ;;  %v864_v3 = vadd.f32 1.0, %v2254_v1 }
 0x48b   : > { %v863_v4 = vadd.f32 1.0, %v2256_v2  ;;  %v606_v2 = vadd.f32 %v1927_v28, %v3012_v15 }
 0x48c   : > { %2257 = vrcp.f32 %v864_v3  ;;  %v603_v3 = vadd.f32 %v1926_v26, %v3012_v15 }
 0x48d   : > { %2259 = vrcp.f32 %v863_v4 }
 0x496   : > { %v2258_v5 = vpop.eup %2257 }
 0x497   : > { %v2260_v7 = vpop.eup %2259  ;;  %v872_v11 = vmul.f32 %v2258_v5, %v754_v46 }
 0x498   : > { %v871_v13 = vmul.f32 %v2260_v7, %v753_v43 }
 0x4fa   : > { %v878_v6 = vpop.permute.xlu1 %877 }
 0x4fb   : > { %v882_v8 = vmul.f32 %v2258_v5, %v878_v6  ;;  %v876_v9 = vpop.permute.xlu0 %875 }
 0x4fc   : > { %v881_v10 = vmul.f32 %v2260_v7, %v876_v9 }
 0x4fd   : > { %887 = vrot.lane.b32.xlu1 %v882_v8, %s2619_s20 }
 0x4fe   : > { %885 = vrot.lane.b32.xlu0 %v881_v10, %s2619_s20 }
 0x56f   : > { %v888_v12 = vpop.permute.xlu1 %887 }
 0x570   : > { %v892_v14 = vadd.f32 %v888_v12, %v872_v11  ;;  %v886_v16 = vpop.permute.xlu0 %885 }
 0x571   : > { %v891_v17 = vadd.f32 %v886_v16, %v871_v13 }
 0x572   : > { %2261 = vtanh.f32 %v892_v14 }
 0x573   : > { %2263 = vtanh.f32 %v891_v17 }
 0x57c   : > { %v2262_v20 = vpop.eup %2261 }
 0x57d   : > { %v2264_v21 = vpop.eup %2263  ;;  %899 = vrot.lane.b32.xlu1 %v2262_v20, %s2620_s19 }
 0x57e   : > { %897 = vrot.lane.b32.xlu0 %v2264_v21, %s2620_s19 }
 0x5ef   : > { %v900_v22 = vpop.permute.xlu1 %899 }
 0x5f0   : > { %v904_v23 = vmul.f32 %v2258_v5, %v900_v22  ;;  %v898_v24 = vpop.permute.xlu0 %897 }
 0x5f1   : > { %v903_v25 = vmul.f32 %v2260_v7, %v898_v24 }
 0x5f2   : > { %912 = vrot.lane.b32.xlu1 %v904_v23, %s2619_s20 }
 0x5f3   : > { %910 = vrot.lane.b32.xlu0 %v903_v25, %s2619_s20 }
 0x664   : > { %v913_v31 = vpop.permute.xlu1 %912 }
 0x665   : > { %v911_v30 = vpop.permute.xlu0 %910 }
 0x666   : > { %1958 = vmatprep.mubr.msk.f32.mxu0 %vm627_vm2, %v911_v30 }
 0x667   : > { %1959 = vmatmul.mubr.msk.f32.vlgmr.msra.gmra.mrb[8].mxu0 %vm627_vm2, %v913_v31 }
 0x73a   : > { %v1960_v34 = vpop.f32.mrb[8].mxu0 }
 0x73b   : > { %v994_v35 = vadd.f32 %v1960_v34, %v598_v32  ;;  %v984_v36 = vpop.f32.mrb[9].mxu0 }
 0x73c   : > { %v993_v37 = vadd.f32 %v984_v36, %v595_v33 }
 0x73d   : > { %2265 = vtanh.f32 %v994_v35  ;;  %v1835_v40 = vmul.f32 -1.442695, %v994_v35 }
 0x73e   : > { %2267 = vtanh.f32 %v993_v37  ;;  %v1834_v41 = vmul.f32 -1.442695, %v993_v37 }
 0x73f   : > { %2269 = vpow2.f32 %v1835_v40  ;;  %v2298_v40 = vld [vmem:[%s2963_s13 + $0x18] sm:$0xff] (!%p1840_p12)  }
 0x740   : > { %2271 = vpow2.f32 %v1834_v41  ;;  %v1843_v41 = vld [vmem:[%s3196_s10] ss:$0 sm:$0xff] (!%p1840_p12) }
 0x747   : > { %v2266_v38 = vpop.eup %2265 }
 0x748   : > { %v2268_v39 = vpop.eup %2267  ;;  %1015 = vrot.lane.b32.xlu1 %v2266_v38, %s2620_s19  ;;  %v2297_v38 = vld [vmem:[#allocation11] sm:$0xff] (!%p1840_p12)  }
 0x749   : > { %1013 = vrot.lane.b32.xlu0 %v2268_v39, %s2620_s19  ;;  %v2270_v42 = vpop.eup %2269  ;;  %v2622_v39 = vmov (!%p1840_p12), 0.0  }
 0x74a   : > { %v2272_v43 = vpop.eup %2271  ;;  %v1002_v44 = vadd.f32 1.0, %v2270_v42  ;;  %1972 = vmatprep.subr.bf16.mxu0 (!%p1840_p12), %v2622_v39  ;;  %1974 = vmatprep.mubr.msk.bf16.mxu0 (!%p1840_p12), %vm2623_vm3, %v2622_v39 }
 0x74b   : > { %v1001_v45 = vadd.f32 1.0, %v2272_v43  ;;  %1973 = vmatpush3.bf16.msra.mxu0 (!%p1840_p12), %v2297_v38 }
 0x74c   : > { %2273 = vrcp.f32 %v1002_v44 }
 0x74d   : > { %2275 = vrcp.f32 %v1001_v45 }
 0x74e   : > { %1975 = vmatmul.mubr.msk.bf16.vlgmr.msra.gmra.mrb[0].mxu0 (!%p1840_p12), %vm531_vm1, %v2298_v40 }
 0x756   : > { %v2274_v46 = vpop.eup %2273 }
 0x757   : > { %v2276_v48 = vpop.eup %2275  ;;  %v1010_v52 = vmul.f32 %v2274_v46, %v892_v14 }
 0x758   : > { %v1009_v54 = vmul.f32 %v2276_v48, %v891_v17 }
 0x7ba   : > { %v1016_v47 = vpop.permute.xlu1 %1015 }
 0x7bb   : > { %v1020_v49 = vmul.f32 %v2274_v46, %v1016_v47  ;;  %v1014_v50 = vpop.permute.xlu0 %1013 }
 0x7bc   : > { %v1019_v51 = vmul.f32 %v2276_v48, %v1014_v50 }
 0x7bd   : > { %1025 = vrot.lane.b32.xlu1 %v1020_v49, %s2619_s20 }
 0x7be   : > { %1023 = vrot.lane.b32.xlu0 %v1019_v51, %s2619_s20 }
 0x821   : > { %v1265_v42 = vpop.f32.mrb[0].mxu0 (!%p1840_p12) }
 0x822   : > { %v1266_v43 = vadd.f32 (!%p1840_p12), %v1843_v41, %v1265_v42  ;;  %v1976_v44 = vpop.f32.mrb[1].mxu0 (!%p1840_p12) }
 0x823   : > { %v1268_v45 = vpop.f32.mrb[2].mxu0 (!%p1840_p12) }
 0x824   : > { %v1977_v47 = vpop.f32.mrb[3].mxu0 (!%p1840_p12)  ;;  %v1847_v50 = vmul.f32 (!%p1840_p12), -1.442695, %v1266_v43 }
 0x82f   : > { %v1026_v53 = vpop.permute.xlu1 %1025 }
 0x830   : > { %v1030_v55 = vadd.f32 %v1026_v53, %v1010_v52  ;;  %v1024_v56 = vpop.permute.xlu0 %1023 }
 0x831   : > { %v1029_v57 = vadd.f32 %v1024_v56, %v1009_v54 }
 0x832   : > { %2277 = vtanh.f32 %v1030_v55 }
 0x833   : > { %2279 = vtanh.f32 %v1029_v57 }
 0x83c   : > { %v2278_v58 = vpop.eup %2277 }
 0x83d   : > { %v2280_v59 = vpop.eup %2279  ;;  %1037 = vrot.lane.b32.xlu1 %v2278_v58, %s2620_s19 }
 0x83e   : > { %1035 = vrot.lane.b32.xlu0 %v2280_v59, %s2620_s19 }
 0x8af   : > { %v1038_v60 = vpop.permute.xlu1 %1037 }
 0x8b0   : > { %v1042_v61 = vmul.f32 %v2274_v46, %v1038_v60  ;;  %v1036_v62 = vpop.permute.xlu0 %1035  ;;  %v1269_v46 = vadd.f32 (!%p1840_p12), %v1843_v41, %v1268_v45 }
 0x8b1   : > { %v1041_v63 = vmul.f32 %v2276_v48, %v1036_v62  ;;  %v1312_v62 = vld [vmem:[#allocation14] sm:$0xff] (!%p1840_p12) }
 0x8b2   : > { %1050 = vrot.lane.b32.xlu1 %v1042_v61, %s2619_s20  ;;  %v1848_v51 = vmul.f32 (!%p1840_p12), -1.442695, %v1269_v46 }
 0x8b3   : > { %1048 = vrot.lane.b32.xlu0 %v1041_v63, %s2619_s20  ;;  %v1313_v63 = vld [vmem:[#allocation14 + $0x8] sm:$0xff] (!%p1840_p12) }
 0x924   : > { %v1051_v1 = vpop.permute.xlu1 %1050 }
 0x925   : > { %v1049_v0 = vpop.permute.xlu0 %1048 }
 0x926   : > { %1969 = vmatprep.mubr.msk.f32.mxu1 %vm627_vm2, %v1049_v0  ;;  %v1484_v0 = vld [vmem:[%s3197_s28] sm:$0xff] (!%p1840_p12) }
 0x927   : > { %1970 = vmatmul.mubr.msk.f32.vlgmr.msra.gmra.mrb[4].mxu1 %vm627_vm2, %v1051_v1  ;;  %v2054_v1 = vpack.c.bf16 (!%p1840_p12), %v1313_v63, %v1312_v62 }
 0x929   : > { %2055 = vmatprep.subr.bf16.mxu1 (!%p1840_p12), %v2054_v1 }
 0x92a   : > { %2057 = vmatpush3.bf16.msra.mxu1 (!%p1840_p12), %v2054_v1 }
 0x9fa   : > { %v1971_v4 = vpop.f32.mrb[4].mxu1 }
 0x9fb   : > { %v1132_v5 = vadd.f32 %v1971_v4, %v606_v2  ;;  %v1122_v6 = vpop.f32.mrb[5].mxu1  ;;  %v1485_v2 = vld [vmem:[%s3197_s28 + $0x8] sm:$0xff] (!%p1840_p12) }
 0x9fc   : > { %v1131_v7 = vadd.f32 %v1122_v6, %v603_v3  ;;  %v1314_v3 = vld [vmem:[#allocation14 + $0x10] sm:$0xff] (!%p1840_p12)  ;;  %v1315_v4 = vld [vmem:[#allocation14 + $0x18] sm:$0xff] (!%p1840_p12) }
 0x9fd   : > { %2281 = vtanh.f32 %v1132_v5  ;;  %v1839_v10 = vmul.f32 -1.442695, %v1132_v5  ;;  %v2070_v5 = vpack.c.bf16 (!%p1840_p12), %v1485_v2, %v1484_v0  ;;  %v2058_v6 = vpack.c.bf16 (!%p1840_p12), %v1315_v4, %v1314_v3 }
 0x9fe   : > { %2283 = vtanh.f32 %v1131_v7  ;;  %v1838_v11 = vmul.f32 -1.442695, %v1131_v7 }
 0x9ff   : > { %2285 = vpow2.f32 %v1839_v10  ;;  %2071 = vmatprep.subr.bf16.mxu0 (!%p1840_p12), %v2070_v5  ;;  %2059 = vmatprep.subr.bf16.mxu1 (!%p1840_p12), %v2058_v6  ;;  %v1487_v10 = vld [vmem:[%s3197_s28 + $0x18] sm:$0xff] (!%p1840_p12) }
 0xa00   : > { %2287 = vpow2.f32 %v1838_v11  ;;  %2073 = vmatpush3.bf16.msra.mxu0 (!%p1840_p12), %v2070_v5  ;;  %2061 = vmatpush3.bf16.msra.mxu1 (!%p1840_p12), %v2058_v6 }
 0xa07   : > { %v2282_v8 = vpop.eup %2281 }
 0xa08   : > { %v2284_v9 = vpop.eup %2283  ;;  %1153 = vrot.lane.b32.xlu1 %v2282_v8, %s2620_s19 }
 0xa09   : > { %1151 = vrot.lane.b32.xlu0 %v2284_v9, %s2620_s19  ;;  %v2286_v12 = vpop.eup %2285  ;;  %v1486_v9 = vld [vmem:[%s3197_s28 + $0x10] sm:$0xff] (!%p1840_p12) }
 0xa0a   : > { %v2288_v13 = vpop.eup %2287  ;;  %v1140_v14 = vadd.f32 1.0, %v2286_v12  ;;  %v2074_v11 = vpack.c.bf16 (!%p1840_p12), %v1487_v10, %v1486_v9  ;;  %v1308_v12 = vld [vmem:[#allocation13] sm:$0xff] (!%p1840_p12) }
 0xa0b   : > { %v1139_v15 = vadd.f32 1.0, %v2288_v13  ;;  %v1309_v13 = vld [vmem:[#allocation13 + $0x8] sm:$0xff] (!%p1840_p12) }
 0xa0c   : > { %2289 = vrcp.f32 %v1140_v14  ;;  %2075 = vmatprep.subr.bf16.mxu0 (!%p1840_p12), %v2074_v11  ;;  %v2062_v14 = vpack.c.bf16 (!%p1840_p12), %v1309_v13, %v1308_v12 }
 0xa0d   : > { %2291 = vrcp.f32 %v1139_v15  ;;  %2077 = vmatpush3.bf16.msra.mxu0 (!%p1840_p12), %v2074_v11  ;;  %v1480_v15 = vld [vmem:[#allocation16] sm:$0xff] (!%p1840_p12) }
 0xa0e   : > { %2063 = vmatprep.subr.bf16.mxu1 (!%p1840_p12), %v2062_v14 }
 0xa16   : > { %v2290_v16 = vpop.eup %2289 }
 0xa17   : > { %v2292_v18 = vpop.eup %2291  ;;  %v1148_v22 = vmul.f32 %v2290_v16, %v1030_v55 }
 0xa18   : > { %v1147_v24 = vmul.f32 %v2292_v18, %v1029_v57 }
 0xa7a   : > { %v1154_v17 = vpop.permute.xlu1 %1153 }
 0xa7b   : > { %v1158_v19 = vmul.f32 %v2290_v16, %v1154_v17  ;;  %v1152_v20 = vpop.permute.xlu0 %1151 }
 0xa7c   : > { %v1157_v21 = vmul.f32 %v2292_v18, %v1152_v20 }
 0xa7d   : > { %1163 = vrot.lane.b32.xlu1 %v1158_v19, %s2619_s20 }
 0xa7e   : > { %1161 = vrot.lane.b32.xlu0 %v1157_v21, %s2619_s20 }
 0xaef   : > { %v1164_v23 = vpop.permute.xlu1 %1163 }
 0xaf0   : > { %v1168_v25 = vadd.f32 %v1164_v23, %v1148_v22  ;;  %v1162_v26 = vpop.permute.xlu0 %1161  ;;  %v1310_v22 = vld [vmem:[#allocation13 + $0x10] sm:$0xff] (!%p1840_p12) }
 0xaf1   : > { %v1167_v27 = vadd.f32 %v1162_v26, %v1147_v24  ;;  %v1311_v24 = vld [vmem:[#allocation13 + $0x18] sm:$0xff] (!%p1840_p12) }
 0xaf2   : > { %2293 = vtanh.f32 %v1168_v25  ;;  %v1483_v26 = vld [vmem:[#allocation16 + $0x18] sm:$0xff] (!%p1840_p12) }
 0xaf3   : > { %2295 = vtanh.f32 %v1167_v27 }
 0xaf4   : > { %2299 = vtanh.f32 (!%p1840_p12), %v1266_v43 }
 0xaf5   : > { %2301 = vtanh.f32 (!%p1840_p12), %v1269_v46 }
 0xaf6   : > { %2303 = vpow2.f32 (!%p1840_p12), %v1847_v50 }
 0xaf7   : > { %2305 = vpow2.f32 (!%p1840_p12), %v1848_v51 }
 0xafc   : > { %v2294_v28 = vpop.eup %2293 }
 0xafd   : > { %v2296_v29 = vpop.eup %2295  ;;  %1175 = vrot.lane.b32.xlu1 %v2294_v28, %s2620_s19 }
 0xafe   : > { %1173 = vrot.lane.b32.xlu0 %v2296_v29, %s2620_s19  ;;  %v2300_v48 = vpop.eup (!%p1840_p12), %2299 }
 0xaff   : > { %v2302_v49 = vpop.eup (!%p1840_p12), %2301 }
 0xb00   : > { %v2304_v52 = vpop.eup (!%p1840_p12), %2303 }
 0xb01   : > { %v1278_v53 = vadd.f32 (!%p1840_p12), 1.0, %v2304_v52  ;;  %v2306_v54 = vpop.eup (!%p1840_p12), %2305 }
 0xb02   : > { %v1279_v55 = vadd.f32 (!%p1840_p12), 1.0, %v2306_v54 }
 0xb03   : > { %2307 = vrcp.f32 (!%p1840_p12), %v1278_v53 }
 0xb04   : > { %2309 = vrcp.f32 (!%p1840_p12), %v1279_v55 }
 0xb0d   : > { %v2308_v56 = vpop.eup (!%p1840_p12), %2307 }
 0xb0e   : > { %v2310_v59 = vpop.eup (!%p1840_p12), %2309 }
 0xb6f   : > { %v1176_v30 = vpop.permute.xlu1 %1175 }
 0xb70   : > { %v1180_v31 = vmul.f32 %v2290_v16, %v1176_v30  ;;  %v1174_v32 = vpop.permute.xlu0 %1173  ;;  %v1481_v16 = vld [vmem:[#allocation16 + $0x8] sm:$0xff] (!%p1840_p12) }
 0xb71   : > { %v1179_v33 = vmul.f32 %v2292_v18, %v1174_v32  ;;  %v2078_v17 = vpack.c.bf16 (!%p1840_p12), %v1481_v16, %v1480_v15 }
 0xb72   : > { %1185 = vrot.lane.b32.xlu1 %v1180_v31, %s2619_s20 }
 0xb73   : > { %1183 = vrot.lane.b32.xlu0 %v1179_v33, %s2619_s20  ;;  %2079 = vmatprep.subr.bf16.mxu0 (!%p1840_p12), %v2078_v17 }
 0xb76   : > { %1195 = vrot.lane.b32.xlu1 %v1168_v25, %s2621_s11  ;;  %v1482_v25 = vld [vmem:[#allocation16 + $0x10] sm:$0xff] (!%p1840_p12) }
 0xb77   : > { %1193 = vrot.lane.b32.xlu0 %v1167_v27, %s2621_s11  ;;  %v2066_v27 = vpack.c.bf16 (!%p1840_p12), %v1311_v24, %v1310_v22  ;;  %v2082_v28 = vpack.c.bf16 (!%p1840_p12), %v1483_v26, %v1482_v25 }
 0xb7b   : > { %1288 = vrot.lane.b32.xlu0 (!%p1840_p12), %v2300_v48, %s2624_s16 }
 0xb7f   : > { %1290 = vrot.lane.b32.xlu0 (!%p1840_p12), %v2302_v49, %s2624_s16 }
 0xbe4   : > { %v3068_v34 = vpop.permute.xlu1 %1185  ;;  %1204 = sbr.rel (%p1840_p12) target bundleno = 3643 (0xe3b), region = 96 }
 0xbe5   : > { %1190 = vst.msk [vmem:[#allocation3 + $0x8] sm:$0xff] %vm627_vm2, %v3068_v34  ;;  %v3072_v35 = vpop.permute.xlu0 %1183 }
 0xbe6   : > { %1189 = vst.msk [vmem:[#allocation3] sm:$0xff] %vm627_vm2, %v3072_v35 }
 0xbe8   : > { %v1196_v36 = vpop.permute.xlu1 %1195 }
 0xbe9   : > { %1200 = vst.msk [vmem:[#allocation4 + $0x8] sm:$0xff] %vm627_vm2, %v1196_v36  ;;  %v1194_v37 = vpop.permute.xlu0 %1193 }
 0xbea   : > { %1199 = vst.msk [vmem:[#allocation4] sm:$0xff] %vm627_vm2, %v1194_v37 }
 0xbed   : > { %v1289_v57 = vpop.permute.xlu0 %1288 }
 0xbee   : > { %v1294_v58 = vmul.f32 %v2308_v56, %v1289_v57 }
 0xbf0   : > { %2311 = vtanh.f32 %v1294_v58 }
 0xbf1   : > { %v1291_v60 = vpop.permute.xlu0 %1290 }
 0xbf2   : > { %v1295_v61 = vmul.f32 %v2310_v59, %v1291_v60 }
 0xbf4   : > { %2313 = vtanh.f32 %v1295_v61 }
 0xbfa   : > { %v2312_v7 = vpop.eup %2311 }
 0xbfb   : > { %1300 = vrot.lane.b32.xlu1 %v2312_v7, %s2625_s1 }
 0xbfe   : > { %v2314_v8 = vpop.eup %2313 }
 0xbff   : > { %1302 = vrot.lane.b32.xlu1 %v2314_v8, %s2625_s1 }
 0xc6d   : > { %v1301_v18 = vpop.permute.xlu1 %1300 }
 0xc6e   : > { %v1306_v19 = vmul.f32 %v2308_v56, %v1301_v18 }
 0xc70   : > { %1318 = vrot.lane.b32.xlu0 %v1306_v19, %s2626_s21 }
 0xc71   : > { %v1303_v20 = vpop.permute.xlu1 %1302 }
 0xc72   : > { %v1307_v21 = vmul.f32 %v2310_v59, %v1303_v20 }
 0xc74   : > { %1320 = vrot.lane.b32.xlu1 %v1307_v21, %s2626_s21 }
 0xce2   : > { %v1319_v23 = vpop.permute.xlu0 %1318 }
 0xce3   : > { %1986 = vmatprep.mubr.msk.f32.mxu1 %vm627_vm2, %v1319_v23  ;;  %2008 = vmatprep.mubr.msk.f32.mxu0 %vm627_vm2, %v1319_v23 }
 0xce6   : > { %v1321_v29 = vpop.permute.xlu1 %1320 }
 0xce7   : > { %1987 = vmatmul.mubr.msk.f32.vlgmr.msra.gmra.mrb[0].mxu1 %vm627_vm2, %v1321_v29  ;;  %2009 = vmatmul.mubr.msk.f32.vlgmr.msra.gmra.mrb[4].mxu0 %vm627_vm2, %v1321_v29 }
 0xce8   : > { %2065 = vmatpush3.bf16.msra.mxu1 %v2062_v14  ;;  %2081 = vmatpush3.bf16.msra.mxu0 %v2078_v17 }
 0xce9   : > { %2067 = vmatprep.subr.bf16.mxu1 %v2066_v27  ;;  %2083 = vmatprep.subr.bf16.mxu0 %v2082_v28 }
 0xcea   : > { %1997 = vmatprep.mubr.msk.f32.mxu1 %vm627_vm2, %v3072_v35  ;;  %2019 = vmatprep.mubr.msk.f32.mxu0 %vm627_vm2, %v3072_v35 }
 0xcec   : > { %2069 = vmatpush3.bf16.msra.mxu1 %v2066_v27  ;;  %2085 = vmatpush3.bf16.msra.mxu0 %v2082_v28 }
 0xcef   : > { %1998 = vmatmul.mubr.msk.f32.vlgmr.msra.gmra.mrb[0].mxu1 %vm627_vm2, %v3068_v34  ;;  %2020 = vmatmul.mubr.msk.f32.vlgmr.msra.gmra.mrb[4].mxu0 %vm627_vm2, %v3068_v34 }
 0xdc2   : > { %v1999_v30 = vpop.f32.mrb[0].mxu1  ;;  %v2021_v31 = vpop.f32.mrb[4].mxu0 }
 0xdc3   : > { %v1645_v32 = vmul.f32 0.5, %v1999_v30  ;;  %v1639_v33 = vand.u32 2147483647, %v2021_v31  ;;  %v1471_v36 = vpop.f32.mrb[1].mxu1  ;;  %v1629_v37 = vpop.f32.mrb[5].mxu0 }
 0xdc4   : > { %v1644_v38 = vmul.f32 0.5, %v1471_v36  ;;  %v1638_v39 = vand.u32 2147483647, %v1629_v37 }
 0xdc5   : > { %v1641_v40 = vadd.f32 %v1999_v30, %v1639_v33  ;;  %1650 = vrot.lane.b32.xlu1 %v1645_v32, %s2626_s21 }
 0xdc6   : > { %v1640_v35 = vadd.f32 %v1638_v39, %v1471_v36  ;;  %1648 = vrot.lane.b32.xlu0 %v1644_v38, %s2626_s21 }
 0xdc7   : > { %v1643_v41 = vmul.f32 0.5, %v1641_v40 }
 0xdc8   : > { %v1642_v42 = vmul.f32 0.5, %v1640_v35 }
 0xe37   : > { %v1651_v43 = vpop.permute.xlu1 %1650 }
 0xe38   : > { %v1655_v34 = vsel %vm627_vm2, %v1643_v41, %v1651_v43  ;;  %v1649_v44 = vpop.permute.xlu0 %1648 }
 0xe39   : > { %1658 = vst.msk [vmem:[#allocation17 + $0x8] sm:$0xff] %vm1656_vm4, %v1655_v34  ;;  %v1654_v45 = vsel %vm627_vm2, %v1642_v42, %v1649_v44 }
 0xe3a   : > { %1657 = vst.msk [vmem:[#allocation17] sm:$0xff] %vm1656_vm4, %v1654_v45 }
 0xe3b PF: > { %s3198_s27 = sadd.s32 4294967295, %s2605_s18   ;;  %s2627_s11 = smov [#allocation17]  }
 0xe3c   : > { %p3116_p6 = scmp.eq.s32.totalorder %s3198_s27, 1  ;;  %s1668_s25 = sshll.u32 %s2627_s11, 4  ;;  %s1669_s25 = int_to_ptr.vmem [resolvable:$true] %s1668_s25 }
 0xe3d   : > { %s2513_s29 = scalar_lea.vmem %s1669_s25, 256  ;;  %p2520_p11 = scmp.lt.s32.totalorder %s1669_s25, %s1669_s25 }
 0xe3e   : > { %p2514_p8 = scmp.ne.s32.totalorder %s1669_s25, %s2513_s29  ;;  %p2521_p13 = scmp.lt.s32.totalorder %s2513_s29, %s2513_s29 }
 0xe40   : > { %p2515_p9 = pnand %p2514_p8, %p3116_p6  ;;  %p2522_p2 = por %p2521_p13, %p2520_p11 }
 0xe42   : > { %p2516_p5 = pneg %p2515_p9 }
 0xe44   : > { %p2523_p7 = pnand %p2522_p2, %p2516_p5 }
 0xe46   : > { %2526 = shalt.err (!%p2523_p7)
}
 0xe47   : > { %s3200_s26 = sld [smem:[#allocation26_spill]] }
 0xe4d   : > { %s2527_s9 = scalar_lea.hbm %s3200_s26, 256 }
 0xe4e   : > { %p2528_p1 = scmp.ne.s32.totalorder %s3200_s26, %s2527_s9  ;;  %p2533_p4 = scmp.lt.u32.totalorder %s2527_s9, %s3200_s26 }
 0xe50   : > { %p2529_p3 = pnand %p2528_p1, %p3116_p6 }
 0xe52   : > { %p2530_p0 = pneg %p2529_p3 }
 0xe54   : > { %p2535_p10 = pnand %p2533_p4, %p2530_p0 }
 0xe56   : > { %2538 = shalt.err (!%p2535_p10)
}
 0xe57   : > { %s2628_s23 = smov 128   ;;  %s2629_s13 = smov 8  }
 0xe58   : > { %2117 = dma.vmem_to_hbm [thread:$0]  (%p3116_p6), %s1669_s25, 256, %s3200_s26, [#allocation7], %s2628_s23, %s2628_s23, %s2629_s13  }
 0xe59   : > { %2580 = dma.done.wait (%p3116_p6), [#allocation7], 256  }
 0xe5a   : > { %2582 = vsyncadd (%p3116_p6), [#allocation7], 4294967040 }
 0xe5b PF: > { %s27_s18 = sadd.s32 1, %s2605_s18   ;;  %s3201_s13 = smov %s2589_s14 }
 0xe5c   : > { %p24_p12 = scmp.ge.s32.totalorder %s27_s18, 4   ;;  %s3202_s14 = smov %s2593_s15 }
 0xe5d   : > { %s3203_s15 = smov %s2913_s5  ;;  %s3204_s16 = smov %s2601_s17 }
 0xe5e   : > { %s3205_s17 = smov %s3207_s24  ;;  %26 = sbr.rel (!%p24_p12) target bundleno = 13 (0xd), region = 134 }
 0xe65   :  { %1684 = vsyncpa [#allocation6], 1 }
 0xe66   :  { %1686 = vsyncpa [#allocation6 + $0x1], 1 }
 0xe67   :  { %1687 = vsyncpa [#allocation9], 1 }
 0xe68   :  { %1688 = vsyncpa [#allocation12], 1 }
 0xe69   :  { %1689 = vsyncpa [#allocation15], 1 }
 0xe6a   :  { %1690 = vsyncpa [#allocation7], 1 }
 0xe6b   :  { %1692 = vsyncpa [#allocation7 + $0x1], 1 }

</bundles_post_ra>
